<compile_context>
chip_gen: v7x
topology: tpu7x:2x2x1
jax: 0.10.0
libtpu: 0.0.40
codegen_flags: <defaults>
</compile_context>

<pallas_src>
import functools
import math

import jax
import jax.numpy as jnp
from jax.experimental import pallas as pl
from jax.experimental.pallas import tpu as pltpu


def _round_up(x, m):
    return ((x + m - 1) // m) * m


def _choose_tiles(n, max_tile_n, max_tile_k):
    """Pick (row tile, adjacency-column tile) for an N-node graph."""
    # Rows per grid step: aim for >= 4 row tiles so v7x's 2 TensorCores each get
    # >= 2 pipelined steps. Sweep max_tile_n up to 512-1024 on v5e/v6e.
    if n <= 64:
        tile_n = _round_up(n, 8)                       # single row tile
    else:
        tile_n = min(max_tile_n, _round_up(-(-n // 4), 16))
    # Reduction (adjacency column) tile: lane dim -> multiple of 128. Caps VMEM
    # independent of N (the adj stripe no longer spans all N columns).
    if n <= max_tile_k:
        tile_k = _round_up(n, 128)
    else:
        tile_k = max_tile_k
    return tile_n, tile_k


def _estimate_vmem_bytes(tile_n, tile_k, c_in, c_out, layer_wb,
                         matmul_dtype, out_dtype):
    mm = jnp.dtype(matmul_dtype).itemsize
    ob = jnp.dtype(out_dtype).itemsize
    total = 0
    total += 2 * tile_n * tile_k * mm                  # adj tile (double buffered)
    total += 2 * tile_k * c_in * mm                    # x tile (double buffered)
    for (w, b) in layer_wb:
        total += 2 * w.size * mm                       # resident weights
        total += 2 * max(b.size, 8 * 128) * 4          # bias, padded to (8,128) f32
    total += 2 * tile_n * c_out * ob                   # output tile
    total += tile_n * c_in * 4                         # f32 accumulator scratch
    total = int(total * 1.5) + (2 << 20)               # headroom for spills/internal
    return max(16 << 20, min(total, 48 << 20))


def _gin_conv_kernel(adj_ref, x_ref, *rest,
                     n_lin, apply_final_relu, matmul_dtype):
    """Fused GINConv (K-tiled sum aggregation) + mlp_model over a row tile.

    Grid = (row_tiles, k_tiles); k is the reduction axis (last, "arbitrary").
    adj_ref already carries the (1 + eps) * I self-loop term.
    """
    wb_refs = rest[:2 * n_lin]
    o_ref = rest[2 * n_lin]
    acc_ref = rest[2 * n_lin + 1]

    k = pl.program_id(1)

    @pl.when(k == 0)
    def _():
        acc_ref[...] = jnp.zeros_like(acc_ref)

    # Partial sum aggregation over this adjacency column block (bf16 MXU, f32 acc).
    acc_ref[...] += jnp.dot(adj_ref[...], x_ref[...],
                            preferred_element_type=jnp.float32)

    @pl.when(k == pl.num_programs(1) - 1)
    def _():
        h = acc_ref[...]                               # f32; self term already folded in
        # mlp_model: Linear -> ReLU for all lins but the last, then the last Linear.
        for l in range(n_lin):
            w = wb_refs[2 * l][...]                    # already matmul_dtype (bf16)
            b = wb_refs[2 * l + 1][...]                # f32, shape (1, out)
            h = jnp.dot(h.astype(matmul_dtype), w,
                        preferred_element_type=jnp.float32) + b
            if l < n_lin - 1:
                h = jnp.maximum(h, 0.0)                # ReLU (dropout: eval no-op)
        if apply_final_relu:
            h = jnp.maximum(h, 0.0)                    # GIN_Variant inter-layer ReLU
        o_ref[...] = h.astype(o_ref.dtype)


def gin_conv_layer(x_pad, adj_pad, layer_wb, *, n_rows, tile_n, tile_k,
                   apply_final_relu, out_dtype, matmul_dtype=jnp.bfloat16,
                   vmem_limit_bytes=None):
    """One GINConv(mlp_model) layer over pre-padded inputs.

    x_pad   : (n_pad_c, c_in)   activations, already in matmul_dtype.
    adj_pad : (n_pad_r, n_pad_c) A + (1 + eps) I, already in matmul_dtype.
    Returns (n_rows, c_out) in out_dtype.
    """
    n_pad_r, n_pad_c = adj_pad.shape
    c_in = x_pad.shape[1]
    n_lin = len(layer_wb)
    c_out = layer_wb[-1][0].shape[1]

    grid = (n_pad_r // tile_n, n_pad_c // tile_k)

    in_specs = [
        pl.BlockSpec((tile_n, tile_k), lambda i, k: (i, k)),   # adj (row, col) tile
        pl.BlockSpec((tile_k, c_in), lambda i, k: (k, 0)),     # matching x rows
    ]
    args = [adj_pad, x_pad]
    for (w, b) in layer_wb:                                    # small, VMEM resident
        in_specs.append(pl.BlockSpec(w.shape, lambda i, k: (0, 0)))
        in_specs.append(pl.BlockSpec(b.shape, lambda i, k: (0, 0)))
        args.append(w.astype(matmul_dtype))                    # MXU operand dtype
        args.append(b.astype(jnp.float32))                     # bias add stays f32

    if vmem_limit_bytes is None:
        vmem_limit_bytes = _estimate_vmem_bytes(
            tile_n, tile_k, c_in, c_out, layer_wb, matmul_dtype, out_dtype)

    kernel = functools.partial(
        _gin_conv_kernel, n_lin=n_lin,
        apply_final_relu=apply_final_relu, matmul_dtype=matmul_dtype)

    out = pl.pallas_call(
        kernel,
        out_shape=jax.ShapeDtypeStruct((n_pad_r, c_out), out_dtype),
        grid_spec=pltpu.PrefetchScalarGridSpec(
            num_scalar_prefetch=0,
            grid=grid,
            in_specs=in_specs,
            out_specs=pl.BlockSpec((tile_n, c_out), lambda i, k: (i, 0)),
            scratch_shapes=[pltpu.VMEM((tile_n, c_in), jnp.float32)]),
        compiler_params=pltpu.CompilerParams(
            dimension_semantics=("parallel", "arbitrary"),
            vmem_limit_bytes=vmem_limit_bytes),
    )(*args)

    return out[:n_rows]


def gin_variant_forward(x, adj, layers_wb, *, eps=0.0, max_tile_n=256,
                        max_tile_k=512, matmul_dtype=jnp.bfloat16):
    """GIN_Variant.forward (eval mode) with a dense adjacency."""
    N = x.shape[0]
    n_layers = len(layers_wb)

    tile_n, tile_k = _choose_tiles(N, max_tile_n, max_tile_k)
    n_pad_r = _round_up(N, tile_n)
    n_pad_c = _round_up(N, tile_k)

    # Fold the GINConv (1 + eps) * x self term into the adjacency BEFORE padding
    # (padded diagonal entries stay zero, so padded rows can never leak into
    # real rows). 0/1 adjacency values are exact in bf16.
    adj_hat = adj.astype(jnp.float32) + (1.0 + eps) * jnp.eye(N, dtype=jnp.float32)
    adj_hat = jnp.pad(adj_hat, ((0, n_pad_r - N), (0, n_pad_c - N)))
    adj_hat = adj_hat.astype(matmul_dtype)

    h = x
    for li, layer_wb in enumerate(layers_wb):
        is_last = li == n_layers - 1
        # Zero-pad aggregation rows and cast once to the MXU operand dtype;
        # inter-layer activations are carried in bf16, final output is f32.
        h_pad = jnp.pad(h, ((0, n_pad_c - h.shape[0]), (0, 0))).astype(matmul_dtype)
        h = gin_conv_layer(
            h_pad, adj_hat, layer_wb,
            n_rows=N, tile_n=tile_n, tile_k=tile_k,
            apply_final_relu=not is_last,
            out_dtype=jnp.float32 if is_last else matmul_dtype,
            matmul_dtype=matmul_dtype)
    return h


def init_linear(key, in_f, out_f):
    """Deterministic PyTorch-Linear-style init (kaiming uniform, fan_in bound)."""
    kw, kb = jax.random.split(key)
    bound_w = math.sqrt(1.0 / in_f) * math.sqrt(3.0)   # kaiming_uniform a=sqrt(5)
    w = jax.random.uniform(kw, (in_f, out_f), jnp.float32, -bound_w, bound_w)
    bound_b = 1.0 / math.sqrt(in_f)
    b = jax.random.uniform(kb, (1, out_f), jnp.float32, -bound_b, bound_b)
    return w, b


if __name__ == "__main__":
    # GIN_Variant config: in_channels=128, hidden_channels=128, out_channels=128
    # (lane-dense feature dims), num_layers=2 GIN convs, mlp_layer=2 lins per
    # GINConv mlp_model, dropout=0.0 (eval), GINConv eps=0.0.
    N, C_IN, HIDDEN, C_OUT = 1024, 128, 128, 128
    NUM_GIN_LAYERS, MLP_LAYER = 2, 2
    EPS = 0.0

    key = jax.random.PRNGKey(0)
    keys = jax.random.split(key, 2 + NUM_GIN_LAYERS * MLP_LAYER)
    k_x, k_adj, k_lins = keys[0], keys[1], keys[2:]

    x = jax.random.normal(k_x, (N, C_IN), jnp.float32)

    # Random sparse-ish symmetric adjacency (dense 0/1 float), no self loops
    # (GINConv adds the self term via (1 + eps) * x, folded into adj_hat).
    a = (jax.random.uniform(k_adj, (N, N)) < 0.01).astype(jnp.float32)
    adj = jnp.maximum(a, a.T)
    adj = adj * (1.0 - jnp.eye(N, dtype=jnp.float32))

    # Per-GIN-layer mlp_model dims: first conv (in->hid->hid), last conv
    # (hid->hid->out); middle convs (if any) are hid->hid->hid.
    conv_dims = ([(C_IN, HIDDEN, HIDDEN)]
                 + [(HIDDEN, HIDDEN, HIDDEN)] * (NUM_GIN_LAYERS - 2)
                 + [(HIDDEN, HIDDEN, C_OUT)])

    layers_wb = []
    ki = 0
    for (d_in, d_hid, d_out) in conv_dims:
        mlp_sizes = [d_in] + [d_hid] * (MLP_LAYER - 1) + [d_out]
        layer = []
        for l in range(MLP_LAYER):
            w, b = init_linear(k_lins[ki], mlp_sizes[l], mlp_sizes[l + 1])
            layer.append((w, b))
            ki += 1
        layers_wb.append(layer)

    out = gin_variant_forward(x, adj, layers_wb, eps=EPS,
                              max_tile_n=256, matmul_dtype=jnp.bfloat16)
    out = jax.block_until_ready(out)

    # Pure-JAX f32 reference (same math, eval mode).
    def reference(x, adj, layers_wb, eps):
        h = x
        for li, layer in enumerate(layers_wb):
            z = (1.0 + eps) * h + adj @ h
            for l, (w, b) in enumerate(layer):
                z = z @ w + b
                if l < len(layer) - 1:
                    z = jnp.maximum(z, 0.0)
            if li < len(layers_wb) - 1:
                z = jnp.maximum(z, 0.0)
            h = z
        return h

    ref = reference(x, adj, layers_wb, EPS)
    rel_err = float(jnp.max(jnp.abs(out - ref)) / (jnp.max(jnp.abs(ref)) + 1e-6))
    assert out.shape == (N, C_OUT), out.shape
    # bf16 MXU operands with f32 accumulation: loosened vs the pure-f32 path.
    assert rel_err < 3e-2, f"max normalized error too large: {rel_err}"

    print("KERNEL_OK")
</pallas_src>

<mosaic_0001>
module attributes {stable_mosaic.version = 11 : i64} {
  func.func @_gin_conv_kernel(%arg0: i32, %arg1: i32, %arg2: memref<256x512xbf16, #tpu.memory_space<vmem>>, %arg3: memref<512x128xbf16, #tpu.memory_space<vmem>>, %arg4: memref<128x128xbf16, #tpu.memory_space<vmem>>, %arg5: memref<1x128xf32, #tpu.memory_space<vmem>>, %arg6: memref<128x128xbf16, #tpu.memory_space<vmem>>, %arg7: memref<1x128xf32, #tpu.memory_space<vmem>>, %arg8: memref<256x128xbf16, #tpu.memory_space<vmem>>, %arg9: memref<256x128xf32, #tpu.memory_space<vmem>>) attributes {dimension_semantics = [#tpu.dimension_semantics<parallel>, #tpu.dimension_semantics<arbitrary>], iteration_bounds = array<i64: 4, 2>, scalar_prefetch = 0 : i64, scratch_operands = 1 : i64, tpu.core_type = #tpu.core_type<tc>, window_params = [{transform_indices = @transform_0, window_bounds = array<i64: 256, 512>}, {transform_indices = @transform_1, window_bounds = array<i64: 512, 128>}, {pipeline_mode = #tpu.pipeline_mode<synchronous>, transform_indices = @transform_2, window_bounds = array<i64: 128, 128>}, {pipeline_mode = #tpu.pipeline_mode<synchronous>, transform_indices = @transform_3, window_bounds = array<i64: 1, 128>}, {pipeline_mode = #tpu.pipeline_mode<synchronous>, transform_indices = @transform_4, window_bounds = array<i64: 128, 128>}, {pipeline_mode = #tpu.pipeline_mode<synchronous>, transform_indices = @transform_5, window_bounds = array<i64: 1, 128>}, {transform_indices = @transform_6, window_bounds = array<i64: 256, 128>}]} {
    %c0_i32 = arith.constant 0 : i32
    %0 = arith.cmpi eq, %arg1, %c0_i32 : i32
    %1 = arith.extui %0 : i1 to i32
    %c0_i32_0 = arith.constant 0 : i32
    %2 = arith.cmpi ne, %1, %c0_i32_0 : i32
    scf.if %2 {
      %cst_9 = arith.constant 0.000000e+00 : f32
      %12 = vector.broadcast %cst_9 : f32 to vector<256x128xf32>
      %c0_10 = arith.constant 0 : index
      %c0_11 = arith.constant 0 : index
      %13 = vector.load %arg9[%c0_10, %c0_11] : memref<256x128xf32, #tpu.memory_space<vmem>>, vector<256x128xf32>
      tpu.vector_store %arg9[%c0_10, %c0_11], %12 {strides = array<i32>} : memref<256x128xf32, #tpu.memory_space<vmem>>, vector<256x128xf32>,
    } else {
    }
    %c0 = arith.constant 0 : index
    %c0_1 = arith.constant 0 : index
    %3 = vector.load %arg9[%c0, %c0_1] : memref<256x128xf32, #tpu.memory_space<vmem>>, vector<256x128xf32>
    %c0_2 = arith.constant 0 : index
    %c0_3 = arith.constant 0 : index
    %4 = vector.load %arg2[%c0_2, %c0_3] : memref<256x512xbf16, #tpu.memory_space<vmem>>, vector<256x512xbf16>
    %c0_4 = arith.constant 0 : index
    %c0_5 = arith.constant 0 : index
    %5 = vector.load %arg3[%c0_4, %c0_5] : memref<512x128xbf16, #tpu.memory_space<vmem>>, vector<512x128xbf16>
    %cst = arith.constant dense<0.000000e+00> : vector<256x128xf32>
    %6 = tpu.matmul %4, %5, %cst {dimension_numbers = #tpu.dot_dimension_numbers<[1], [0], [0], [1], [0, 0, 1, 1], [], []>} : vector<256x512xbf16>, vector<512x128xbf16>, vector<256x128xf32> -> vector<256x128xf32>
    %7 = arith.addf %3, %6 : vector<256x128xf32>
    %c0_6 = arith.constant 0 : index
    %c0_7 = arith.constant 0 : index
    %8 = vector.load %arg9[%c0_6, %c0_7] : memref<256x128xf32, #tpu.memory_space<vmem>>, vector<256x128xf32>
    tpu.vector_store %arg9[%c0_6, %c0_7], %7 {strides = array<i32>} : memref<256x128xf32, #tpu.memory_space<vmem>>, vector<256x128xf32>,
    %c1_i32 = arith.constant 1 : i32
    %9 = arith.cmpi eq, %arg1, %c1_i32 : i32
    %10 = arith.extui %9 : i1 to i32
    %c0_i32_8 = arith.constant 0 : i32
    %11 = arith.cmpi ne, %10, %c0_i32_8 : i32
    scf.if %11 {
      %c0_9 = arith.constant 0 : index
      %c0_10 = arith.constant 0 : index
      %12 = vector.load %arg9[%c0_9, %c0_10] : memref<256x128xf32, #tpu.memory_space<vmem>>, vector<256x128xf32>
      %c0_11 = arith.constant 0 : index
      %c0_12 = arith.constant 0 : index
      %13 = vector.load %arg4[%c0_11, %c0_12] : memref<128x128xbf16, #tpu.memory_space<vmem>>, vector<128x128xbf16>
      %c0_13 = arith.constant 0 : index
      %c0_14 = arith.constant 0 : index
      %14 = vector.load %arg5[%c0_13, %c0_14] : memref<1x128xf32, #tpu.memory_space<vmem>>, vector<1x128xf32>
      %15 = arith.truncf %12 : vector<256x128xf32> to vector<256x128xbf16>
      %cst_15 = arith.constant dense<0.000000e+00> : vector<256x128xf32>
      %16 = tpu.matmul %15, %13, %cst_15 {dimension_numbers = #tpu.dot_dimension_numbers<[1], [0], [0], [1], [0, 0, 1, 1], [], []>} : vector<256x128xbf16>, vector<128x128xbf16>, vector<256x128xf32> -> vector<256x128xf32>
      %17 = vector.broadcast %14 : vector<1x128xf32> to vector<256x128xf32>
      %18 = arith.addf %16, %17 : vector<256x128xf32>
      %cst_16 = arith.constant 0.000000e+00 : f32
      %19 = vector.broadcast %cst_16 : f32 to vector<256x128xf32>
      %20 = arith.maximumf %18, %19 : vector<256x128xf32>
      %c0_17 = arith.constant 0 : index
      %c0_18 = arith.constant 0 : index
      %21 = vector.load %arg6[%c0_17, %c0_18] : memref<128x128xbf16, #tpu.memory_space<vmem>>, vector<128x128xbf16>
      %c0_19 = arith.constant 0 : index
      %c0_20 = arith.constant 0 : index
      %22 = vector.load %arg7[%c0_19, %c0_20] : memref<1x128xf32, #tpu.memory_space<vmem>>, vector<1x128xf32>
      %23 = arith.truncf %20 : vector<256x128xf32> to vector<256x128xbf16>
      %cst_21 = arith.constant dense<0.000000e+00> : vector<256x128xf32>
      %24 = tpu.matmul %23, %21, %cst_21 {dimension_numbers = #tpu.dot_dimension_numbers<[1], [0], [0], [1], [0, 0, 1, 1], [], []>} : vector<256x128xbf16>, vector<128x128xbf16>, vector<256x128xf32> -> vector<256x128xf32>
      %25 = vector.broadcast %22 : vector<1x128xf32> to vector<256x128xf32>
      %26 = arith.addf %24, %25 : vector<256x128xf32>
      %cst_22 = arith.constant 0.000000e+00 : f32
      %27 = vector.broadcast %cst_22 : f32 to vector<256x128xf32>
      %28 = arith.maximumf %26, %27 : vector<256x128xf32>
      %29 = arith.truncf %28 : vector<256x128xf32> to vector<256x128xbf16>
      %c0_23 = arith.constant 0 : index
      %c0_24 = arith.constant 0 : index
      %30 = vector.load %arg8[%c0_23, %c0_24] : memref<256x128xbf16, #tpu.memory_space<vmem>>, vector<256x128xbf16>
      tpu.vector_store %arg8[%c0_23, %c0_24], %29 {strides = array<i32>} : memref<256x128xbf16, #tpu.memory_space<vmem>>, vector<256x128xbf16>,
    } else {
    }
    return
  }
  func.func @transform_0(%arg0: i32, %arg1: i32) -> (i32, i32) {
    %c0_i32 = arith.constant 0 : i32
    return %arg0, %arg1 : i32, i32
  }
  func.func @transform_1(%arg0: i32, %arg1: i32) -> (i32, i32) {
    %c0_i32 = arith.constant 0 : i32
    %c0_i32_0 = arith.constant 0 : i32
    return %arg1, %c0_i32 : i32, i32
  }
  func.func @transform_2(%arg0: i32, %arg1: i32) -> (i32, i32) {
    %c0_i32 = arith.constant 0 : i32
    %c0_i32_0 = arith.constant 0 : i32
    %c0_i32_1 = arith.constant 0 : i32
    return %c0_i32, %c0_i32_0 : i32, i32
  }
  func.func @transform_3(%arg0: i32, %arg1: i32) -> (i32, i32) {
    %c0_i32 = arith.constant 0 : i32
    %c0_i32_0 = arith.constant 0 : i32
    %c0_i32_1 = arith.constant 0 : i32
    return %c0_i32, %c0_i32_0 : i32, i32
  }
  func.func @transform_4(%arg0: i32, %arg1: i32) -> (i32, i32) {
    %c0_i32 = arith.constant 0 : i32
    %c0_i32_0 = arith.constant 0 : i32
    %c0_i32_1 = arith.constant 0 : i32
    return %c0_i32, %c0_i32_0 : i32, i32
  }
  func.func @transform_5(%arg0: i32, %arg1: i32) -> (i32, i32) {
    %c0_i32 = arith.constant 0 : i32
    %c0_i32_0 = arith.constant 0 : i32
    %c0_i32_1 = arith.constant 0 : i32
    return %c0_i32, %c0_i32_0 : i32, i32
  }
  func.func @transform_6(%arg0: i32, %arg1: i32) -> (i32, i32) {
    %c0_i32 = arith.constant 0 : i32
    %c0_i32_0 = arith.constant 0 : i32
    return %arg0, %c0_i32 : i32, i32
  }
}

</mosaic_0001>

<bundles_post_ra>
// kernel: tpu_custom_call.1
= control target key start
LH: loop header
LB: loop body
LE: loop exit
PB: predicated region body
PF: predicated region fallthrough
CT: control target
= control target key end

     0   :  { %s4426_s0 = inlined_call_operand.hbm [shape: bf16[1024,1024], index: 0, kind: input, shape index: {}]   ;;  %s4427_s1 = inlined_call_operand.hbm [shape: bf16[1024,128], index: 1, kind: input, shape index: {}]   ;;  %s4428_s2 = inlined_call_operand.hbm [shape: bf16[128,128], index: 2, kind: input, shape index: {}]   ;;  %s4429_s3 = inlined_call_operand.hbm [shape: f32[1,128], index: 3, kind: input, shape index: {}]   ;;  %s4430_s4 = inlined_call_operand.hbm [shape: bf16[128,128], index: 4, kind: input, shape index: {}]   ;;  %s4431_s5 = inlined_call_operand.hbm [shape: f32[1,128], index: 5, kind: input, shape index: {}]   ;;  %s4432_s6 = inlined_call_operand.hbm [shape: bf16[1024,128], index: 6, kind: output, shape index: {}]  }
   0x1   :  { %4458 = sst [smem:[#allocation32_spill]] %s4426_s0 }
   0x2   :  { %4459 = sst [smem:[#allocation33_spill]] %s4428_s2 }
   0x3   :  { %4460 = sst [smem:[#allocation34_spill]] %s4429_s3 }
   0x4   :  { %4461 = sst [smem:[#allocation35_spill]] %s4430_s4 }
   0x5   :  { %4462 = sst [smem:[#allocation36_spill]] %s4431_s5 }
   0x6   :  { %4463 = sst [smem:[#allocation37_spill]] %s4432_s6 }
   0x7   :  { %11 = vsyncpa [#allocation4], 0 }
   0x8   :  { %13 = vsyncpa [#allocation4 + $0x1], 0 }
   0x9   :  { %14 = vsyncpa [#allocation7], 0 }
   0xa   :  { %16 = vsyncpa [#allocation7 + $0x1], 0 }
   0xb   :  { %17 = vsyncpa [#allocation10], 0 }
   0xc   :  { %18 = vsyncpa [#allocation13], 0 }
   0xd   :  { %19 = vsyncpa [#allocation5], 0 }
   0xe   :  { %21 = vsyncpa [#allocation5 + $0x1], 0  ;;  %s3783_s21 = smov 0   ;;  %s3785_s22 = smov 0  }
   0xf   :  { %s3787_s23 = smov 0   ;;  %s3789_s24 = smov 0  }
  0x10   :  { %s3791_s25 = smov 0   ;;  %s3793_s26 = smov 0  }
  0x11   :  { %s3795_s27 = smov 0   ;;  %s3797_s28 = smov 0  }
  0x12   :  { %s3799_s29 = smov 0   ;;  %s3801_s30 = smov 0  }
  0x13   :  { %s3803_s7 = smov 0   ;;  %s3805_s8 = smov 0  }
  0x14   :  { %s3807_s9 = smov 0   ;;  %s3809_s10 = smov 0  }
  0x15 LB: > { %4464 = sst [smem:[#allocation21_spill]] %s3679_s21  ;;  %s3850_s11 = sadd.s32 4294967295, %s3731_s10   ;;  %s3731_s10 = sphi %s3809_s10, %s27_s10   ;;  %s3727_s9 = sphi %s3807_s9, %s4521_s9   ;;  %s3723_s8 = sphi %s3805_s8, %s4532_s8   ;;  %s3719_s7 = sphi %s3803_s7, %s4519_s7   ;;  %s3715_s30 = sphi %s3801_s30, %s4531_s30   ;;  %s3711_s29 = sphi %s3799_s29, %s4530_s29   ;;  %s3707_s28 = sphi %s3797_s28, %s4529_s28   ;;  %s3703_s27 = sphi %s3795_s27, %s4528_s27   ;;  %s3699_s26 = sphi %s3793_s26, %s4527_s26   ;;  %s3695_s25 = sphi %s3791_s25, %s4526_s25   ;;  %s3691_s24 = sphi %s3789_s24, %s4525_s24   ;;  %s3687_s23 = sphi %s3787_s23, %s4524_s23   ;;  %s3683_s22 = sphi %s3785_s22, %s4523_s22   ;;  %s3679_s21 = sphi %s3783_s21, %s4522_s21  }
  0x16   : > { %4465 = sst [smem:[#allocation22_spill]] %s3683_s22  ;;  %s2399_s12 = sadd.s32 4294967294, %s3731_s10  }
  0x17   : > { %4466 = sst [smem:[#allocation23_spill]] %s3715_s30  ;;  %p61_p0 = scmp.ne.s32.totalorder %s3707_s28, %s3703_s27 }
  0x18   : > { %4467 = sst [smem:[#allocation24_spill]] %s3719_s7  ;;  %p4438_p1 = scmp.eq.s32.totalorder %s3850_s11, 0 }
  0x19   : > { %4468 = sst [smem:[#allocation25_spill]] %s3727_s9  ;;  %p87_p2 = scmp.ne.s32.totalorder %s3695_s25, %s3691_s24 }
  0x1a   : > { %4469 = sst [smem:[#allocation26_spill]] %s3850_s11  ;;  %p194_p3 = scmp.ne.s32.totalorder %s3687_s23, %s3683_s22 }
  0x1b   : > { %p3860_p4 = por %p4438_p1, %p61_p0  ;;  %p195_p5 = scmp.eq.s32.totalorder %s3850_s11, 7 }
  0x1c   : > { %p3867_p6 = por %p87_p2, %p4438_p1  ;;  %p200_p7 = scmp.ne.s32.totalorder %s3683_s22, %s3679_s21 }
  0x1d   : > { %s4470_s13 = scalar_select %p3860_p4, 1, 0 }
  0x1e   : > { %s4471_s14 = scalar_select %p3867_p6, 1, 0 }
  0x1f   : > { %p3873_p8 = por %p195_p5, %p194_p3  ;;  %p201_p9 = scmp.eq.s32.totalorder %s2399_s12, 7 }
  0x20   : > { %4472 = sst [smem:[#allocation27_spill]] %s4471_s14  ;;  %p2400_p10 = scmp.ge.s32.totalorder %s3731_s10, 1 }
  0x21   : > { %s4473_s15 = scalar_select %p3873_p8, 1, 0 }
  0x22   : > { %p208_p11 = scmp.lt.s32.totalorder %s3731_s10, 9  ;;  %p3879_p12 = por %p201_p9, %p200_p7 }
  0x23   : > { %4474 = sst [smem:[#allocation28_spill]] %s4473_s15  ;;  %s3733_s18 = smov [#allocation8]  }
  0x24   : > { %s4475_s16 = scalar_select %p3879_p12, 1, 0 }
  0x25   : > { %p3883_p13 = pnand %p2400_p10, %p208_p11  ;;  %s220_s19 = sshll.u32 %s3733_s18, 4  ;;  %s221_s19 = int_to_ptr.vmem [resolvable:$true] %s220_s19 }
  0x26   : > { %4476 = sst [smem:[#allocation29_spill]] %s4475_s16  ;;  %s3734_s24 = smov [#allocation9]  }
  0x27   : > { %s4477_s17 = scalar_select %p3883_p13, 1, 0 }
  0x28   : > { %p3095_p0 = pneg %p3883_p13  ;;  %s234_s27 = sshll.u32 %s3734_s24, 4  ;;  %s3895_s27 = int_to_ptr.vmem [resolvable:$true] %s234_s27 }
  0x29   : > { %s4479_s2 = sld [smem:[#allocation33_spill]] }
  0x2a   : > { %p3891_p2 = pnand %p3095_p0, %p4438_p1 }
  0x2c   : > { %p3905_p5 = pneg %p3891_p2 }
  0x2f   : > { %s3397_s21 = scalar_lea.hbm %s4479_s2, 1024 }
  0x30   : > { %p3398_p3 = scmp.ne.s32.totalorder %s4479_s2, %s3397_s21  ;;  %p3404_p10 = scmp.lt.u32.totalorder %s3397_s21, %s4479_s2 }
  0x32   : > { %p3400_p7 = pnand %p3905_p5, %p3398_p3 }
  0x34   : > { %p3401_p9 = pneg %p3400_p7 }
  0x36   : > { %p3406_p11 = pnand %p3404_p10, %p3401_p9 }
  0x38   : > { %3409 = shalt.err (!%p3406_p11)
}
  0x39   : > { %s3410_s16 = scalar_lea.vmem %s221_s19, 1024  ;;  %p3418_p8 = scmp.lt.s32.totalorder %s221_s19, %s221_s19 }
  0x3a   : > { %p3411_p0 = scmp.ne.s32.totalorder %s221_s19, %s3410_s16  ;;  %p3419_p6 = scmp.lt.s32.totalorder %s3410_s16, %s3410_s16 }
  0x3c   : > { %p3413_p1 = pnand %p3411_p0, %p3905_p5  ;;  %p3420_p4 = por %p3419_p6, %p3418_p8 }
  0x3e   : > { %p3414_p12 = pneg %p3413_p1 }
  0x40   : > { %p3421_p13 = pnand %p3420_p4, %p3414_p12 }
  0x42   : > { %3424 = shalt.err (!%p3421_p13)
}
  0x43   : > { %s4449_s6 = smov 64   ;;  %s4451_s15 = smov 4  }
  0x44   : > { %3098 = dma.hbm_to_vmem [thread:$0]  (!%p3891_p2), %s4479_s2, 1024, %s221_s19, [#allocation7], %s4449_s6, %s4449_s6, %s4451_s15  }
  0x45   : > { %s4481_s3 = sld [smem:[#allocation34_spill]] }
  0x4b   : > { %s3425_s30 = scalar_lea.hbm %s4481_s3, 16 }
  0x4c   : > { %p3426_p1 = scmp.ne.s32.totalorder %s4481_s3, %s3425_s30  ;;  %p3432_p8 = scmp.lt.u32.totalorder %s3425_s30, %s4481_s3 }
  0x4e   : > { %p3428_p4 = pnand %p3426_p1, %p3905_p5 }
  0x50   : > { %p3429_p6 = pneg %p3428_p4 }
  0x52   : > { %p3434_p12 = pnand %p3432_p8, %p3429_p6 }
  0x54   : > { %3437 = shalt.err (!%p3434_p12)
}
  0x55   : > { %s3438_s19 = scalar_lea.vmem %s3895_s27, 16  ;;  %s3445_s22 = scalar_lea.vmem %s3895_s27, 32 }
  0x56   : > { %p3439_p13 = scmp.ne.s32.totalorder %s3895_s27, %s3438_s19  ;;  %p3446_p9 = scmp.lt.s32.totalorder %s3895_s27, %s3895_s27 }
  0x57   : > { %p3447_p10 = scmp.lt.s32.totalorder %s3445_s22, %s3438_s19 }
  0x58   : > { %p3441_p3 = pnand %p3439_p13, %p3905_p5 }
  0x59   : > { %p3448_p11 = por %p3447_p10, %p3446_p9 }
  0x5a   : > { %p3442_p7 = pneg %p3441_p3 }
  0x5c   : > { %p3449_p0 = pnand %p3448_p11, %p3442_p7 }
  0x5e   : > { %3452 = shalt.err (!%p3449_p0)
}
  0x5f   : > { %3101 = dma.hbm_to_vmem [thread:$0]  (!%p3891_p2), %s4481_s3, 16, %s3895_s27, [#allocation10]  }
  0x60   : > { %s3737_s14 = smov [#allocation11]   ;;  %s3738_s7 = smov [#allocation12]  }
  0x61   : > { %s244_s21 = sshll.u32 %s3737_s14, 4  ;;  %s258_s12 = sshll.u32 %s3738_s7, 4  ;;  %s245_s21 = int_to_ptr.vmem [resolvable:$true] %s244_s21  ;;  %s259_s12 = int_to_ptr.vmem [resolvable:$true] %s258_s12 }
  0x62   : > { %s4482_s4 = sld [smem:[#allocation35_spill]] }
  0x68   : > { %s3453_s19 = scalar_lea.hbm %s4482_s4, 1024 }
  0x69   : > { %p3454_p1 = scmp.ne.s32.totalorder %s4482_s4, %s3453_s19  ;;  %p3460_p8 = scmp.lt.u32.totalorder %s3453_s19, %s4482_s4 }
  0x6b   : > { %p3456_p4 = pnand %p3454_p1, %p3905_p5 }
  0x6d   : > { %p3457_p6 = pneg %p3456_p4 }
  0x6f   : > { %p3462_p12 = pnand %p3460_p8, %p3457_p6 }
  0x71   : > { %3465 = shalt.err (!%p3462_p12)
}
  0x72   : > { %s3466_s27 = scalar_lea.vmem %s245_s21, 1024  ;;  %p3474_p9 = scmp.lt.s32.totalorder %s245_s21, %s245_s21 }
  0x73   : > { %p3467_p13 = scmp.ne.s32.totalorder %s245_s21, %s3466_s27  ;;  %p3475_p10 = scmp.lt.s32.totalorder %s3466_s27, %s3466_s27 }
  0x75   : > { %p3469_p3 = pnand %p3467_p13, %p3905_p5  ;;  %p3476_p11 = por %p3475_p10, %p3474_p9 }
  0x77   : > { %p3470_p7 = pneg %p3469_p3 }
  0x79   : > { %p3477_p0 = pnand %p3476_p11, %p3470_p7 }
  0x7b   : > { %3480 = shalt.err (!%p3477_p0)
}
  0x7c   : > { %s4483_s6 = smov 4   ;;  %s4484_s11 = smov 64  }
  0x7d   : > { %3104 = dma.hbm_to_vmem [thread:$0]  (!%p3891_p2), %s4482_s4, 1024, %s245_s21, [#allocation10], %s4484_s11, %s4484_s11, %s4483_s6  }
  0x7e   : > { %s4485_s5 = sld [smem:[#allocation36_spill]] }
  0x84   : > { %s3481_s16 = scalar_lea.hbm %s4485_s5, 16 }
  0x85   : > { %p3482_p1 = scmp.ne.s32.totalorder %s4485_s5, %s3481_s16  ;;  %p3488_p8 = scmp.lt.u32.totalorder %s3481_s16, %s4485_s5 }
  0x87   : > { %p3484_p4 = pnand %p3482_p1, %p3905_p5 }
  0x89   : > { %p3485_p6 = pneg %p3484_p4 }
  0x8b   : > { %p3490_p12 = pnand %p3488_p8, %p3485_p6 }
  0x8d   : > { %3493 = shalt.err (!%p3490_p12)
}
  0x8e   : > { %s3494_s15 = scalar_lea.vmem %s259_s12, 16  ;;  %s3501_s21 = scalar_lea.vmem %s259_s12, 32 }
  0x8f   : > { %p3495_p13 = scmp.ne.s32.totalorder %s259_s12, %s3494_s15  ;;  %p3502_p9 = scmp.lt.s32.totalorder %s259_s12, %s259_s12 }
  0x90   : > { %p3503_p10 = scmp.lt.s32.totalorder %s3501_s21, %s3494_s15 }
  0x91   : > { %p3497_p3 = pnand %p3495_p13, %p3905_p5 }
  0x92   : > { %p3504_p11 = por %p3503_p10, %p3502_p9 }
  0x93   : > { %p3498_p7 = pneg %p3497_p3 }
  0x95   : > { %p3505_p0 = pnand %p3504_p11, %p3498_p7 }
  0x97   : > { %3508 = shalt.err (!%p3505_p0)
}
  0x98   : > { %3107 = dma.hbm_to_vmem [thread:$0]  (!%p3891_p2), %s4485_s5, 16, %s259_s12, [#allocation13]  }
  0x99   : > { %s36_s18 = sadd.s32 1, %s3723_s8  ;;  %s39_s20 = sadd.s32 1, %s3727_s9 }
  0x9a   : > { %p37_p5 = scmp.ge.s32.totalorder %s36_s18, 2  ;;  %s48_s24 = sadd.s32 1, %s3711_s29 }
  0x9b   : > { %p55_p1 = scmp.ne.s32.totalorder %s3711_s29, %s3707_s28  ;;  %p4456_p4 = scmp.eq.s32.totalorder %s3731_s10, 0 }
  0x9c   : > { %s4534_s18 = smov (%p37_p5, %s36_s18), 0  ;;  %s4536_s20 = smov (!%p37_p5, %s39_s20), %s3727_s9 }
  0x9d   : > { %4486 = sst [smem:[#allocation30_spill]] %s4534_s18  ;;  %s3997_s16 = ssub.s32 %s3723_s8, %s4534_s18 }
  0x9e   : > { %p41_p2 = scmp.ge.s32.totalorder %s4536_s20, 4  ;;  %p72_p6 = scmp.eq.s32.totalorder %s3997_s16, 0 }
  0x9f   : > { %p4003_p8 = por %p4456_p4, %p55_p1  ;;  %s184_s19 = sadd.s32 1, %s3687_s23 }
  0xa0   : > { %s4538_s20 = smov (%p41_p2, %s4536_s20), 0  ;;  %p4455_p12 = scmp.lt.s32.totalorder %s3731_s10, 8 }
  0xa1   : > { %4488 = sst [smem:[#allocation31_spill]] %s4538_s20  ;;  %s269_s22 = sand.u32 1, %s3711_s29  }
  0xa2   : > { %s43_s30 = ssub.s32 %s3727_s9, %s4538_s20  ;;  %s2406_s15 = sshll.u32 %s269_s22, 9 }
  0xa3   : > { %s45_s27 = sor.u32 %s3997_s16, %s43_s30  ;;  %p182_p13 = scmp.eq.s32.totalorder %s43_s30, 0 }
  0xa4   : > { %p46_p3 = scmp.eq.s32.totalorder %s45_s27, 0  ;;  %s2408_s7 = sshll.u32 %s3723_s8, 2 }
  0xa5   : > { %s4016_s21 = scalar_select %p182_p13, %s3687_s23, %s184_s19  }
  0xa6   : > { %s4019_s14 = scalar_select %p46_p3, %s3711_s29, %s48_s24  }
  0xa7   : > { %s2575_s2 = sshll.u32 %s3727_s9, 8  ;;  %s273_s3 = scalar_lea.vmem [#allocation3], %s2406_s15 }
  0xa8   : > { %s283_s4 = sshll.u32 %s273_s3, 4  ;;  %s280_s5 = sadd.s32 %s2575_s2, %s2408_s7  ;;  %s4023_s4 = int_to_ptr.vmem [resolvable:$true] %s283_s4 }
  0xa9   : > { %s2410_s18 = sshll.u32 %s280_s5, 6  ;;  %p4029_p7 = pnand %p4455_p12, %p4003_p8 }
  0xaa   : > { %s4490_s0 = sld [smem:[#allocation32_spill]]  ;;  %s4038_s2 = scalar_lea.sflag [#allocation4], %s269_s22 }
  0xab   : > { %p3511_p10 = pneg %p4029_p7 }
  0xb0   : > { %s4036_s24 = scalar_lea.hbm %s4490_s0, %s2410_s18  ;;  %s3514_s19 = scalar_lea.hbm %s4490_s0, 65536 }
  0xb1   : > { %s3509_s3 = scalar_lea.hbm %s4036_s24, 8192  ;;  %p3515_p5 = scmp.lt.u32.totalorder %s4036_s24, %s4490_s0 }
  0xb2   : > { %p3510_p9 = scmp.ne.s32.totalorder %s4036_s24, %s3509_s3  ;;  %p3516_p1 = scmp.lt.u32.totalorder %s3514_s19, %s3509_s3 }
  0xb3   : > { %p3518_p8 = scmp.lt.u32.totalorder %s3509_s3, %s4036_s24 }
  0xb4   : > { %p3512_p11 = pnand %p3511_p10, %p3510_p9  ;;  %p3517_p2 = por %p3516_p1, %p3515_p5 }
  0xb6   : > { %p3513_p0 = pneg %p3512_p11  ;;  %p3519_p13 = por %p3518_p8, %p3517_p2 }
  0xb8   : > { %p3520_p3 = pnand %p3519_p13, %p3513_p0 }
  0xba   : > { %3523 = shalt.err (!%p3520_p3)
}
  0xbb   : > { %s3524_s22 = scalar_lea.vmem %s4023_s4, 8192  ;;  %s3739_s7 = smov [#allocation3]  }
  0xbc   : > { %p3525_p9 = scmp.ne.s32.totalorder %s4023_s4, %s3524_s22  ;;  %s3529_s30 = sshll.u32 %s3739_s7, 4  ;;  %s3530_s30 = int_to_ptr.vmem [resolvable:$false] %s3529_s30 }
  0xbd   : > { %s3531_s27 = scalar_lea.vmem %s3530_s30, 16384  ;;  %p3532_p4 = scmp.lt.s32.totalorder %s4023_s4, %s3530_s30 }
  0xbe   : > { %p3527_p11 = pnand %p3525_p9, %p3511_p10  ;;  %p3533_p5 = scmp.lt.s32.totalorder %s3531_s27, %s3524_s22 }
  0xc0   : > { %p3528_p12 = pneg %p3527_p11  ;;  %p3534_p1 = por %p3533_p5, %p3532_p4 }
  0xc2   : > { %p3535_p2 = pnand %p3534_p1, %p3528_p12 }
  0xc4   : > { %3538 = shalt.err (!%p3535_p2)
}
  0xc5   : > { %s3740_s3 = smov 512   ;;  %s3741_s5 = smov 256  }
  0xc6   : > { %s3742_s12 = smov 16   ;;  %s293_s19 = sand.u32 1, %s3731_s10  }
  0xc7   : > { %3111 = dma.hbm_to_vmem [thread:$0]  (!%p4029_p7), %s4036_s24, 8192, %s4023_s4, %s4038_s2, %s3740_s3, %s3741_s5, %s3742_s12  }
  0xc8   : > { %s74_s18 = sadd.s32 1, %s3699_s26  ;;  %p81_p4 = scmp.ne.s32.totalorder %s3699_s26, %s3695_s25 }
  0xc9   : > { %s4073_s15 = scalar_select %p72_p6, %s3699_s26, %s74_s18  }
  0xca   : > { %p4491_p12 = scmp.eq.s32.totalorder %s3731_s10, 0  ;;  %s295_s22 = sand.u32 1, %s3699_s26  }
  0xcb   : > { %s2576_s7 = sshll.u32 %s3723_s8, 12  ;;  %s2411_s30 = sshll.u32 %s295_s22, 8 }
  0xcc   : > { %p83_p10 = por %p81_p4, %p4491_p12  ;;  %s4082_s9 = scalar_lea.hbm %s4427_s1, %s2576_s7 }
  0xcd   : > { %p4492_p0 = scmp.lt.s32.totalorder %s3731_s10, 8  ;;  %s297_s20 = scalar_lea.vmem [#allocation6], %s2411_s30 }
  0xce   : > { %s304_s16 = sshll.u32 %s297_s20, 4  ;;  %s4092_s24 = scalar_lea.sflag [#allocation7], %s293_s19  ;;  %s4090_s16 = int_to_ptr.vmem [resolvable:$true] %s304_s16 }
  0xcf   : > { %p4086_p7 = pnand %p4492_p0, %p83_p10  ;;  %s3539_s0 = scalar_lea.hbm %s4082_s9, 4096 }
  0xd0   : > { %p3540_p6 = scmp.ne.s32.totalorder %s4082_s9, %s3539_s0  ;;  %s3544_s5 = scalar_lea.hbm %s4427_s1, 8192 }
  0xd1   : > { %p3541_p8 = pneg %p4086_p7  ;;  %p3545_p9 = scmp.lt.u32.totalorder %s4082_s9, %s4427_s1 }
  0xd2   : > { %p3546_p11 = scmp.lt.u32.totalorder %s3544_s5, %s3539_s0  ;;  %p3548_p1 = scmp.lt.u32.totalorder %s3539_s0, %s4082_s9 }
  0xd3   : > { %p3542_p13 = pnand %p3541_p8, %p3540_p6 }
  0xd4   : > { %p3547_p5 = por %p3546_p11, %p3545_p9 }
  0xd5   : > { %p3543_p3 = pneg %p3542_p13 }
  0xd6   : > { %p3549_p2 = por %p3548_p1, %p3547_p5 }
  0xd8   : > { %p3550_p4 = pnand %p3549_p2, %p3543_p3 }
  0xda   : > { %3553 = shalt.err (!%p3550_p4)
}
  0xdb   : > { %s3554_s19 = scalar_lea.vmem %s4090_s16, 4096  ;;  %s3743_s22 = smov [#allocation6]  }
  0xdc   : > { %p3555_p12 = scmp.ne.s32.totalorder %s4090_s16, %s3554_s19  ;;  %s3559_s7 = sshll.u32 %s3743_s22, 4  ;;  %s3560_s7 = int_to_ptr.vmem [resolvable:$false] %s3559_s7 }
  0xdd   : > { %s3561_s30 = scalar_lea.vmem %s3560_s7, 8192  ;;  %p3562_p6 = scmp.lt.s32.totalorder %s4090_s16, %s3560_s7 }
  0xde   : > { %p3557_p10 = pnand %p3555_p12, %p3541_p8  ;;  %p3563_p13 = scmp.lt.s32.totalorder %s3561_s30, %s3554_s19 }
  0xe0   : > { %p3558_p0 = pneg %p3557_p10  ;;  %p3564_p9 = por %p3563_p13, %p3562_p6 }
  0xe2   : > { %p3565_p11 = pnand %p3564_p9, %p3558_p0 }
  0xe4   : > { %3568 = shalt.err (!%p3565_p11)
}
  0xe5   : > { %3114 = dma.hbm_to_vmem [thread:$0]  (!%p4086_p7), %s4082_s9, 4096, %s4090_s16, %s4092_s24, %s4484_s11, %s4484_s11, %s4483_s6  }
  0xe6   : > { %p4494_p8 = scmp.ne.s32.totalorder %s4477_s17, 0 }
  0xe7   : > { %s318_s27 = sand.u32 (!%p4494_p8), 1, %s3707_s28   ;;  %p4495_p3 = scmp.ne.s32.totalorder (!%p4494_p8), %s4470_s13, 0 }
  0xe8   : > { %316 = sbr.rel (%p4494_p8) target bundleno = 1189 (0x4a5), region = 44  ;;  %s2415_s20 = sshll.u32 (!%p4494_p8), %s318_s27, 9 }
  0xe9   : > { %s319_s0 = scalar_lea.sflag (!%p4494_p8), [#allocation4], %s318_s27  ;;  %s4126_s2 = scalar_lea.vmem (!%p4494_p8), [#allocation3], %s2415_s20 }
  0xef   : > { %3654 = dma.done.wait (%p4495_p3), %s319_s0, 8192  }
  0xf0   : > { %3656 = vsyncadd (%p4495_p3), %s319_s0, 4294959104  ;;  %s4496_s4 = sld [smem:[#allocation26_spill]]  ;;  %s4497_s3 = sld [smem:[#allocation27_spill]] }
  0xf1   : > { %s329_s9 = sand.u32 1, %s3695_s25  }
  0xf2   : > { %s2416_s6 = sshll.u32 %s329_s9, 8 }
  0xf3   : > { %s4134_s11 = scalar_lea.vmem [#allocation6], %s2416_s6 }
  0xf6   : > { %s327_s5 = sand.u32 1, %s4496_s4   ;;  %p4498_p7 = scmp.ne.s32.totalorder %s4497_s3, 0 }
  0xf7   : > { %s328_s17 = scalar_lea.sflag [#allocation7], %s327_s5 }
  0xf8   : > { %3658 = dma.done.wait (%p4498_p7), %s328_s17, 4096  }
  0xf9   : > { %3660 = vsyncadd (%p4498_p7), %s328_s17, 4294963200  ;;  %p4499_p5 = scmp.eq.s32.totalorder %s4496_s4, 0 }
  0xfb   : > { %3662 = dma.done.wait (%p4499_p5), [#allocation7], 1024   ;;  %p4500_p1 = pmov %p4499_p5 }
  0xfd   : > { %3664 = vsyncadd (%p4500_p1), [#allocation7], 4294966272  ;;  %p4501_p2 = pmov %p4500_p1 }
  0xfe   : > { %p4502_p4 = pmov %p4500_p1 }
  0xff   : > { %3666 = dma.done.wait (%p4501_p2), [#allocation10], 1040  }
 0x100   : > { %3668 = vsyncadd (%p4502_p4), [#allocation10], 4294966256  ;;  %p4503_p12 = pmov %p4500_p1 }
 0x101   : > { %p4504_p10 = pmov %p4500_p1 }
 0x102   : > { %3670 = dma.done.wait (%p4503_p12), [#allocation13], 16  }
 0x103   : > { %3672 = vsyncadd (%p4504_p10), [#allocation13], 4294967280  ;;  %s4505_s13 = sld [smem:[#allocation22_spill]]  ;;  %s4506_s18 = sld [smem:[#allocation23_spill]] }
 0x109   : > { %s378_s16 = sand.u32 1, %s4505_s13   ;;  %p2422_p0 = scmp.ne.s32.totalorder %s4506_s18, 0 }
 0x10a   : > { %s2421_s24 = sshll.u32 %s378_s16, 7  ;;  %v3744_v0 = vmov (!%p2422_p0), 0.0  }
 0x10b   : > { %s4155_s12 = scalar_lea.vmem [#allocation14], %s2421_s24  ;;  %389 = sbr.rel (%p2422_p0) target bundleno = 283 (0x11b), region = 72  ;;  %390 = vst [vmem:[#allocation2] sm:$0xff] (!%p2422_p0), %v3744_v0  ;;  %391 = vst [vmem:[#allocation2 + $0x8] sm:$0xff] (!%p2422_p0), %v3744_v0 }
 0x10c   : > { %392 = vst [vmem:[#allocation2 + $0x10] sm:$0xff] (!%p2422_p0), %v3744_v0  ;;  %393 = vst [vmem:[#allocation2 + $0x18] sm:$0xff] (!%p2422_p0), %v3744_v0 }
 0x10d   : > { %394 = vst [vmem:[#allocation2 + $0x20] sm:$0xff] (!%p2422_p0), %v3744_v0  ;;  %395 = vst [vmem:[#allocation2 + $0x28] sm:$0xff] (!%p2422_p0), %v3744_v0 }
 0x10e   : > { %396 = vst [vmem:[#allocation2 + $0x30] sm:$0xff] (!%p2422_p0), %v3744_v0  ;;  %397 = vst [vmem:[#allocation2 + $0x38] sm:$0xff] (!%p2422_p0), %v3744_v0 }
 0x10f   : > { %398 = vst [vmem:[#allocation2 + $0x40] sm:$0xff] (!%p2422_p0), %v3744_v0  ;;  %399 = vst [vmem:[#allocation2 + $0x48] sm:$0xff] (!%p2422_p0), %v3744_v0 }
 0x110   : > { %400 = vst [vmem:[#allocation2 + $0x50] sm:$0xff] (!%p2422_p0), %v3744_v0  ;;  %401 = vst [vmem:[#allocation2 + $0x58] sm:$0xff] (!%p2422_p0), %v3744_v0 }
 0x111   : > { %402 = vst [vmem:[#allocation2 + $0x60] sm:$0xff] (!%p2422_p0), %v3744_v0  ;;  %403 = vst [vmem:[#allocation2 + $0x68] sm:$0xff] (!%p2422_p0), %v3744_v0 }
 0x112   : > { %404 = vst [vmem:[#allocation2 + $0x70] sm:$0xff] %v3744_v0  ;;  %405 = vst [vmem:[#allocation2 + $0x78] sm:$0xff] %v3744_v0 }
 0x113   : > { %406 = vst [vmem:[#allocation2 + $0x80] sm:$0xff] %v3744_v0  ;;  %407 = vst [vmem:[#allocation2 + $0x88] sm:$0xff] %v3744_v0 }
 0x114   : > { %408 = vst [vmem:[#allocation2 + $0x90] sm:$0xff] %v3744_v0  ;;  %409 = vst [vmem:[#allocation2 + $0x98] sm:$0xff] %v3744_v0 }
 0x115   : > { %410 = vst [vmem:[#allocation2 + $0xa0] sm:$0xff] %v3744_v0  ;;  %411 = vst [vmem:[#allocation2 + $0xa8] sm:$0xff] %v3744_v0 }
 0x116   : > { %412 = vst [vmem:[#allocation2 + $0xb0] sm:$0xff] %v3744_v0  ;;  %413 = vst [vmem:[#allocation2 + $0xb8] sm:$0xff] %v3744_v0 }
 0x117   : > { %414 = vst [vmem:[#allocation2 + $0xc0] sm:$0xff] %v3744_v0  ;;  %415 = vst [vmem:[#allocation2 + $0xc8] sm:$0xff] %v3744_v0 }
 0x118   : > { %416 = vst [vmem:[#allocation2 + $0xd0] sm:$0xff] %v3744_v0  ;;  %417 = vst [vmem:[#allocation2 + $0xd8] sm:$0xff] %v3744_v0 }
 0x119   : > { %418 = vst [vmem:[#allocation2 + $0xe0] sm:$0xff] %v3744_v0  ;;  %419 = vst [vmem:[#allocation2 + $0xe8] sm:$0xff] %v3744_v0 }
 0x11a   : > { %420 = vst [vmem:[#allocation2 + $0xf0] sm:$0xff] %v3744_v0  ;;  %421 = vst [vmem:[#allocation2 + $0xf8] sm:$0xff] %v3744_v0 }
 0x11b PF: > { %v3253_v1 = vld [vmem:[%s4134_s11 + $0x40] sm:$0xff]   ;;  %v3257_v5 = vld [vmem:[%s4134_s11 + $0x48] sm:$0xff]   ;;  %v3261_v9 = vld [vmem:[%s4134_s11 + $0x50] sm:$0xff]   ;;  %s4507_s19 = sld [smem:[#allocation23_spill]] }
 0x11c   : > { %v3254_v2 = vld [vmem:[%s4134_s11 + $0xc0] sm:$0xff]   ;;  %2705 = vmatprep.subr.bf16.mxu0 %v3253_v1  ;;  %v3258_v6 = vld [vmem:[%s4134_s11 + $0xc8] sm:$0xff]   ;;  %v3262_v10 = vld [vmem:[%s4134_s11 + $0xd0] sm:$0xff]  }
 0x11d   : > { %v3255_v3 = vld [vmem:[%s4134_s11] sm:$0xff]   ;;  %2817 = vmatprep.subr.bf16.mxu1 %v3254_v2  ;;  %v3259_v7 = vld [vmem:[%s4134_s11 + $0x8] sm:$0xff]   ;;  %v3263_v11 = vld [vmem:[%s4134_s11 + $0x10] sm:$0xff]  }
 0x11e   : > { %v3256_v4 = vld [vmem:[%s4134_s11 + $0x80] sm:$0xff]   ;;  %2706 = vmatpush3.bf16.msra.mxu0 %v3255_v3  ;;  %v3260_v8 = vld [vmem:[%s4134_s11 + $0x88] sm:$0xff]   ;;  %v3264_v12 = vld [vmem:[%s4134_s11 + $0x90] sm:$0xff]  }
 0x11f   : > { %2818 = vmatpush3.bf16.msra.mxu1 %v3256_v4  ;;  %2707 = vmatprep.subr.bf16.mxu0 %v3257_v5  ;;  %v3265_v13 = vld [vmem:[%s4134_s11 + $0x58] sm:$0xff]   ;;  %v3269_v17 = vld [vmem:[%s4134_s11 + $0x60] sm:$0xff]   ;;  %v3273_v21 = vld [vmem:[%s4134_s11 + $0x68] sm:$0xff]  }
 0x120   : > { %2819 = vmatprep.subr.bf16.mxu1 %v3258_v6  ;;  %v3266_v14 = vld [vmem:[%s4134_s11 + $0xd8] sm:$0xff]   ;;  %v3270_v18 = vld [vmem:[%s4134_s11 + $0xe0] sm:$0xff]   ;;  %v3274_v22 = vld [vmem:[%s4134_s11 + $0xe8] sm:$0xff]  }
 0x121   : > { %v3267_v15 = vld [vmem:[%s4134_s11 + $0x18] sm:$0xff]   ;;  %v3271_v19 = vld [vmem:[%s4134_s11 + $0x20] sm:$0xff]   ;;  %v3275_v23 = vld [vmem:[%s4134_s11 + $0x28] sm:$0xff]   ;;  %p2519_p6 = scmp.ne.s32.totalorder %s4507_s19, 1 }
 0x122   : > { %2708 = vmatpush3.bf16.msra.mxu0 %v3259_v7  ;;  %v3268_v16 = vld [vmem:[%s4134_s11 + $0x98] sm:$0xff]   ;;  %v3272_v20 = vld [vmem:[%s4134_s11 + $0xa0] sm:$0xff]   ;;  %v3276_v24 = vld [vmem:[%s4134_s11 + $0xa8] sm:$0xff]  }
 0x123   : > { %2820 = vmatpush3.bf16.msra.mxu1 %v3260_v8  ;;  %2709 = vmatprep.subr.bf16.mxu0 %v3261_v9  ;;  %v3277_v25 = vld [vmem:[%s4134_s11 + $0x70] sm:$0xff]   ;;  %v3281_v29 = vld [vmem:[%s4134_s11 + $0x78] sm:$0xff]  }
 0x124   : > { %2821 = vmatprep.subr.bf16.mxu1 %v3262_v10  ;;  %v3278_v26 = vld [vmem:[%s4134_s11 + $0xf0] sm:$0xff]   ;;  %v3282_v30 = vld [vmem:[%s4134_s11 + $0xf8] sm:$0xff]  }
 0x125   : > { %v3279_v27 = vld [vmem:[%s4134_s11 + $0x30] sm:$0xff]   ;;  %v3283_v31 = vld [vmem:[%s4134_s11 + $0x38] sm:$0xff]  }
 0x126   : > { %2710 = vmatpush3.bf16.msra.mxu0 %v3263_v11  ;;  %v3280_v28 = vld [vmem:[%s4134_s11 + $0xb0] sm:$0xff]   ;;  %v3284_v32 = vld [vmem:[%s4134_s11 + $0xb8] sm:$0xff]  }
 0x127   : > { %2822 = vmatpush3.bf16.msra.mxu1 %v3264_v12  ;;  %2711 = vmatprep.subr.bf16.mxu0 %v3265_v13  ;;  %v3285_v33 = vld [vmem:[%s4126_s2] ss:$16 sps:$4 sm:$0xff]   ;;  %v3287_v34 = vld [vmem:[%s4126_s2 + $0x4] ss:$16 sps:$4 sm:$0xff]   ;;  %v3288_v35 = vld [vmem:[%s4126_s2 + $0x8] ss:$16 sps:$4 sm:$0xff]  }
 0x128   : > { %2823 = vmatprep.subr.bf16.mxu1 %v3266_v14  ;;  %v3290_v36 = vld [vmem:[%s4126_s2 + $0xc] ss:$16 sps:$4 sm:$0xff]   ;;  %1126 = vmatprep.mubr.bf16.mxu0 %v3287_v34  ;;  %v3291_v37 = vld [vmem:[%s4126_s2 + $0x24] ss:$16 sps:$4 sm:$0xff]   ;;  %v3295_v39 = vld [vmem:[%s4126_s2 + $0x20] ss:$16 sps:$4 sm:$0xff]  }
 0x129   : > { %1287 = vmatprep.mubr.bf16.mxu1 %v3290_v36  ;;  %v3293_v38 = vld [vmem:[%s4126_s2 + $0x2c] ss:$16 sps:$4 sm:$0xff]   ;;  %v3296_v40 = vld [vmem:[%s4126_s2 + $0x28] ss:$16 sps:$4 sm:$0xff]   ;;  %v3297_v41 = vld [vmem:[%s4126_s2 + $0x44] ss:$16 sps:$4 sm:$0xff]  }
 0x12a   : > { %2712 = vmatpush3.bf16.msra.mxu0 %v3267_v15  ;;  %v3299_v42 = vld [vmem:[%s4126_s2 + $0x4c] ss:$16 sps:$4 sm:$0xff]   ;;  %v3301_v43 = vld [vmem:[%s4126_s2 + $0x40] ss:$16 sps:$4 sm:$0xff]   ;;  %v3302_v44 = vld [vmem:[%s4126_s2 + $0x48] ss:$16 sps:$4 sm:$0xff]  }
 0x12b   : > { %2824 = vmatpush3.bf16.msra.mxu1 %v3268_v16  ;;  %2713 = vmatprep.subr.bf16.mxu0 %v3269_v17  ;;  %v3303_v45 = vld [vmem:[%s4126_s2 + $0x64] ss:$16 sps:$4 sm:$0xff]   ;;  %v3305_v46 = vld [vmem:[%s4126_s2 + $0x6c] ss:$16 sps:$4 sm:$0xff]   ;;  %v3307_v47 = vld [vmem:[%s4126_s2 + $0x60] ss:$16 sps:$4 sm:$0xff]  }
 0x12c   : > { %2825 = vmatprep.subr.bf16.mxu1 %v3270_v18  ;;  %v3308_v48 = vld [vmem:[%s4126_s2 + $0x68] ss:$16 sps:$4 sm:$0xff]   ;;  %v3309_v49 = vld [vmem:[%s4126_s2 + $0x84] ss:$16 sps:$4 sm:$0xff]   ;;  %v3311_v50 = vld [vmem:[%s4126_s2 + $0x8c] ss:$16 sps:$4 sm:$0xff]  }
 0x12d   : > { %v3313_v51 = vld [vmem:[%s4126_s2 + $0x80] ss:$16 sps:$4 sm:$0xff]   ;;  %v3314_v52 = vld [vmem:[%s4126_s2 + $0x88] ss:$16 sps:$4 sm:$0xff]   ;;  %v3315_v53 = vld [vmem:[%s4126_s2 + $0xa4] ss:$16 sps:$4 sm:$0xff]  }
 0x12e   : > { %2714 = vmatpush3.bf16.msra.mxu0 %v3271_v19  ;;  %v3317_v54 = vld [vmem:[%s4126_s2 + $0xac] ss:$16 sps:$4 sm:$0xff]   ;;  %v3319_v55 = vld [vmem:[%s4126_s2 + $0xa0] ss:$16 sps:$4 sm:$0xff]   ;;  %v3320_v56 = vld [vmem:[%s4126_s2 + $0xa8] ss:$16 sps:$4 sm:$0xff]  }
 0x12f   : > { %2826 = vmatpush3.bf16.msra.mxu1 %v3272_v20  ;;  %2715 = vmatprep.subr.bf16.mxu0 %v3273_v21  ;;  %v3321_v57 = vld [vmem:[%s4126_s2 + $0xc4] ss:$16 sps:$4 sm:$0xff]   ;;  %v3323_v58 = vld [vmem:[%s4126_s2 + $0xcc] ss:$16 sps:$4 sm:$0xff]   ;;  %v3325_v59 = vld [vmem:[%s4126_s2 + $0xc0] ss:$16 sps:$4 sm:$0xff]  }
 0x130   : > { %2827 = vmatprep.subr.bf16.mxu1 %v3274_v22  ;;  %v3326_v60 = vld [vmem:[%s4126_s2 + $0xc8] ss:$16 sps:$4 sm:$0xff]   ;;  %v3327_v61 = vld [vmem:[%s4126_s2 + $0xe4] ss:$16 sps:$4 sm:$0xff]   ;;  %v3329_v62 = vld [vmem:[%s4126_s2 + $0xec] ss:$16 sps:$4 sm:$0xff]  }
 0x131   : > { %v3331_v63 = vld [vmem:[%s4126_s2 + $0xe0] ss:$16 sps:$4 sm:$0xff]   ;;  %v3332_v0 = vld [vmem:[%s4126_s2 + $0xe8] ss:$16 sps:$4 sm:$0xff]   ;;  %v3333_v1 = vld [vmem:[%s4126_s2 + $0x104] ss:$16 sps:$4 sm:$0xff]  }
 0x132   : > { %2716 = vmatpush3.bf16.msra.mxu0 %v3275_v23  ;;  %v3335_v2 = vld [vmem:[%s4126_s2 + $0x10c] ss:$16 sps:$4 sm:$0xff]   ;;  %v3337_v3 = vld [vmem:[%s4126_s2 + $0x100] ss:$16 sps:$4 sm:$0xff]   ;;  %v3338_v4 = vld [vmem:[%s4126_s2 + $0x108] ss:$16 sps:$4 sm:$0xff]  }
 0x133   : > { %2828 = vmatpush3.bf16.msra.mxu1 %v3276_v24  ;;  %2717 = vmatprep.subr.bf16.mxu0 %v3277_v25  ;;  %v3339_v5 = vld [vmem:[%s4126_s2 + $0x124] ss:$16 sps:$4 sm:$0xff]   ;;  %v3341_v6 = vld [vmem:[%s4126_s2 + $0x12c] ss:$16 sps:$4 sm:$0xff]   ;;  %v3343_v7 = vld [vmem:[%s4126_s2 + $0x120] ss:$16 sps:$4 sm:$0xff]  }
 0x134   : > { %2829 = vmatprep.subr.bf16.mxu1 %v3278_v26  ;;  %v3344_v8 = vld [vmem:[%s4126_s2 + $0x128] ss:$16 sps:$4 sm:$0xff]   ;;  %v3345_v9 = vld [vmem:[%s4126_s2 + $0x144] ss:$16 sps:$4 sm:$0xff]   ;;  %v3347_v10 = vld [vmem:[%s4126_s2 + $0x14c] ss:$16 sps:$4 sm:$0xff]  }
 0x135   : > { %v3349_v11 = vld [vmem:[%s4126_s2 + $0x140] ss:$16 sps:$4 sm:$0xff]   ;;  %v3350_v12 = vld [vmem:[%s4126_s2 + $0x148] ss:$16 sps:$4 sm:$0xff]   ;;  %v3351_v13 = vld [vmem:[%s4126_s2 + $0x164] ss:$16 sps:$4 sm:$0xff]  }
 0x136   : > { %2718 = vmatpush3.bf16.msra.mxu0 %v3279_v27  ;;  %v3353_v14 = vld [vmem:[%s4126_s2 + $0x16c] ss:$16 sps:$4 sm:$0xff]   ;;  %v3355_v15 = vld [vmem:[%s4126_s2 + $0x160] ss:$16 sps:$4 sm:$0xff]   ;;  %v3356_v16 = vld [vmem:[%s4126_s2 + $0x168] ss:$16 sps:$4 sm:$0xff]  }
 0x137   : > { %2830 = vmatpush3.bf16.msra.mxu1 %v3280_v28  ;;  %2719 = vmatprep.subr.bf16.mxu0 %v3281_v29  ;;  %v3357_v17 = vld [vmem:[%s4126_s2 + $0x184] ss:$16 sps:$4 sm:$0xff]   ;;  %v3359_v18 = vld [vmem:[%s4126_s2 + $0x18c] ss:$16 sps:$4 sm:$0xff]   ;;  %v3361_v19 = vld [vmem:[%s4126_s2 + $0x180] ss:$16 sps:$4 sm:$0xff]  }
 0x138   : > { %2831 = vmatprep.subr.bf16.mxu1 %v3282_v30  ;;  %v3362_v20 = vld [vmem:[%s4126_s2 + $0x188] ss:$16 sps:$4 sm:$0xff]   ;;  %v3363_v21 = vld [vmem:[%s4126_s2 + $0x1a4] ss:$16 sps:$4 sm:$0xff]   ;;  %v3365_v22 = vld [vmem:[%s4126_s2 + $0x1ac] ss:$16 sps:$4 sm:$0xff]  }
 0x139   : > { %v3367_v23 = vld [vmem:[%s4126_s2 + $0x1a0] ss:$16 sps:$4 sm:$0xff]   ;;  %v3368_v24 = vld [vmem:[%s4126_s2 + $0x1a8] ss:$16 sps:$4 sm:$0xff]   ;;  %v3369_v25 = vld [vmem:[%s4126_s2 + $0x1c4] ss:$16 sps:$4 sm:$0xff]  }
 0x13a   : > { %2720 = vmatpush3.bf16.msra.mxu0 %v3283_v31  ;;  %v3371_v26 = vld [vmem:[%s4126_s2 + $0x1cc] ss:$16 sps:$4 sm:$0xff]   ;;  %v3373_v27 = vld [vmem:[%s4126_s2 + $0x1c0] ss:$16 sps:$4 sm:$0xff]   ;;  %v3374_v28 = vld [vmem:[%s4126_s2 + $0x1c8] ss:$16 sps:$4 sm:$0xff]  }
 0x13b   : > { %2832 = vmatpush3.bf16.msra.mxu1 %v3284_v32  ;;  %v3375_v29 = vld [vmem:[%s4126_s2 + $0x1e4] ss:$16 sps:$4 sm:$0xff]   ;;  %v3377_v30 = vld [vmem:[%s4126_s2 + $0x1ec] ss:$16 sps:$4 sm:$0xff]   ;;  %v3379_v31 = vld [vmem:[%s4126_s2 + $0x1e0] ss:$16 sps:$4 sm:$0xff]  }
 0x13c   : > { %v3380_v32 = vld [vmem:[%s4126_s2 + $0x1e8] ss:$16 sps:$4 sm:$0xff]  }
 0x13d   : > { %1127 = vmatmul.mubr.bf16.vlgmr.msra.gmra.mrb[0].mxu0 %v3285_v33 }
 0x13e   : > { %1288 = vmatmul.mubr.bf16.vlgmr.msra.gmra.mrb[0].mxu1 %v3288_v35  ;;  %1134 = vmatprep.mubr.bf16.mxu0 %v3291_v37 }
 0x13f   : > { %1295 = vmatprep.mubr.bf16.mxu1 %v3293_v38 }
 0x145   : > { %1135 = vmatmul.mubr.bf16.gmra.mrb[4].mxu0 %v3295_v39 }
 0x146   : > { %1296 = vmatmul.mubr.bf16.gmra.mrb[4].mxu1 %v3296_v40  ;;  %1142 = vmatprep.mubr.bf16.mxu0 %v3297_v41 }
 0x147   : > { %1303 = vmatprep.mubr.bf16.mxu1 %v3299_v42  ;;  %v422_v42 = vld [vmem:[#allocation2] sm:$0xff] }
 0x14d   : > { %1143 = vmatmul.mubr.bf16.gmra.mrb[8].mxu0 %v3301_v43 }
 0x14e   : > { %1304 = vmatmul.mubr.bf16.gmra.mrb[8].mxu1 %v3302_v44  ;;  %1150 = vmatprep.mubr.bf16.mxu0 %v3303_v45 }
 0x14f   : > { %1311 = vmatprep.mubr.bf16.mxu1 %v3305_v46 }
 0x155   : > { %1151 = vmatmul.mubr.bf16.gmra.mrb[12].mxu0 %v3307_v47  ;;  %v423_v47 = vld [vmem:[#allocation2 + $0x8] sm:$0xff] }
 0x156   : > { %1312 = vmatmul.mubr.bf16.gmra.mrb[12].mxu1 %v3308_v48  ;;  %1158 = vmatprep.mubr.bf16.mxu0 %v3309_v49 }
 0x157   : > { %1319 = vmatprep.mubr.bf16.mxu1 %v3311_v50 }
 0x15d   : > { %1159 = vmatmul.mubr.bf16.gmra.mrb[16].mxu0 %v3313_v51 }
 0x15e   : > { %1320 = vmatmul.mubr.bf16.gmra.mrb[16].mxu1 %v3314_v52  ;;  %1166 = vmatprep.mubr.bf16.mxu0 %v3315_v53 }
 0x15f   : > { %1327 = vmatprep.mubr.bf16.mxu1 %v3317_v54 }
 0x165   : > { %1167 = vmatmul.mubr.bf16.gmra.mrb[20].mxu0 %v3319_v55 }
 0x166   : > { %1328 = vmatmul.mubr.bf16.gmra.mrb[20].mxu1 %v3320_v56  ;;  %1174 = vmatprep.mubr.bf16.mxu0 %v3321_v57 }
 0x167   : > { %1335 = vmatprep.mubr.bf16.mxu1 %v3323_v58 }
 0x16d   : > { %1175 = vmatmul.mubr.bf16.gmra.mrb[24].mxu0 %v3325_v59 }
 0x16e   : > { %1336 = vmatmul.mubr.bf16.gmra.mrb[24].mxu1 %v3326_v60  ;;  %1182 = vmatprep.mubr.bf16.mxu0 %v3327_v61  ;;  %v424_v60 = vld [vmem:[#allocation2 + $0x10] sm:$0xff] }
 0x16f   : > { %1343 = vmatprep.mubr.bf16.mxu1 %v3329_v62 }
 0x175   : > { %1183 = vmatmul.mubr.bf16.gmra.mrb[28].mxu0 %v3331_v63 }
 0x176   : > { %1344 = vmatmul.mubr.bf16.gmra.mrb[28].mxu1 %v3332_v0  ;;  %1190 = vmatprep.mubr.bf16.mxu0 %v3333_v1  ;;  %v425_v1 = vld [vmem:[#allocation2 + $0x18] sm:$0xff] }
 0x177   : > { %1351 = vmatprep.mubr.bf16.mxu1 %v3335_v2 }
 0x17d   : > { %1191 = vmatmul.mubr.bf16.gmra.mrb[32].mxu0 %v3337_v3 }
 0x17e   : > { %1352 = vmatmul.mubr.bf16.gmra.mrb[32].mxu1 %v3338_v4  ;;  %1198 = vmatprep.mubr.bf16.mxu0 %v3339_v5 }
 0x17f   : > { %1359 = vmatprep.mubr.bf16.mxu1 %v3341_v6 }
 0x185   : > { %1199 = vmatmul.mubr.bf16.gmra.mrb[36].mxu0 %v3343_v7 }
 0x186   : > { %1360 = vmatmul.mubr.bf16.gmra.mrb[36].mxu1 %v3344_v8  ;;  %1206 = vmatprep.mubr.bf16.mxu0 %v3345_v9 }
 0x187   : > { %1367 = vmatprep.mubr.bf16.mxu1 %v3347_v10 }
 0x18d   : > { %1207 = vmatmul.mubr.bf16.gmra.mrb[40].mxu0 %v3349_v11 }
 0x18e   : > { %1368 = vmatmul.mubr.bf16.gmra.mrb[40].mxu1 %v3350_v12  ;;  %1214 = vmatprep.mubr.bf16.mxu0 %v3351_v13 }
 0x18f   : > { %1375 = vmatprep.mubr.bf16.mxu1 %v3353_v14  ;;  %v426_v14 = vld [vmem:[#allocation2 + $0x20] sm:$0xff] }
 0x195   : > { %1215 = vmatmul.mubr.bf16.gmra.mrb[44].mxu0 %v3355_v15 }
 0x196   : > { %1376 = vmatmul.mubr.bf16.gmra.mrb[44].mxu1 %v3356_v16  ;;  %1222 = vmatprep.mubr.bf16.mxu0 %v3357_v17 }
 0x197   : > { %1383 = vmatprep.mubr.bf16.mxu1 %v3359_v18 }
 0x19d   : > { %1223 = vmatmul.mubr.bf16.gmra.mrb[48].mxu0 %v3361_v19  ;;  %v427_v19 = vld [vmem:[#allocation2 + $0x28] sm:$0xff] }
 0x19e   : > { %1384 = vmatmul.mubr.bf16.gmra.mrb[48].mxu1 %v3362_v20  ;;  %1230 = vmatprep.mubr.bf16.mxu0 %v3363_v21 }
 0x19f   : > { %1391 = vmatprep.mubr.bf16.mxu1 %v3365_v22 }
 0x1a5   : > { %1231 = vmatmul.mubr.bf16.gmra.mrb[52].mxu0 %v3367_v23 }
 0x1a6   : > { %1392 = vmatmul.mubr.bf16.gmra.mrb[52].mxu1 %v3368_v24  ;;  %1238 = vmatprep.mubr.bf16.mxu0 %v3369_v25 }
 0x1a7   : > { %1399 = vmatprep.mubr.bf16.mxu1 %v3371_v26 }
 0x1ad   : > { %1239 = vmatmul.mubr.bf16.gmra.mrb[56].mxu0 %v3373_v27 }
 0x1ae   : > { %1400 = vmatmul.mubr.bf16.gmra.mrb[56].mxu1 %v3374_v28  ;;  %1246 = vmatprep.mubr.bf16.mxu0 %v3375_v29 }
 0x1af   : > { %1407 = vmatprep.mubr.bf16.mxu1 %v3377_v30 }
 0x1b5   : > { %1247 = vmatmul.mubr.bf16.gmra.mrb[60].mxu0 %v3379_v31 }
 0x1b6   : > { %1408 = vmatmul.mubr.bf16.gmra.mrb[60].mxu1 %v3380_v32  ;;  %v428_v32 = vld [vmem:[#allocation2 + $0x30] sm:$0xff] }
 0x210   : > { %v2721_v33 = vpop.f32.mrb[0].mxu0 }
 0x211   : > { %v2833_v34 = vpop.f32.mrb[0].mxu1  ;;  %v2722_v35 = vpop.f32.mrb[1].mxu0 }
 0x212   : > { %v2723_v36 = vadd.f32 %v2722_v35, %v2721_v33  ;;  %v2834_v37 = vpop.f32.mrb[1].mxu1  ;;  %v2724_v38 = vpop.f32.mrb[2].mxu0 }
 0x213   : > { %v2835_v39 = vadd.f32 %v2834_v37, %v2833_v34  ;;  %v2836_v40 = vpop.f32.mrb[2].mxu1  ;;  %v2725_v41 = vpop.f32.mrb[3].mxu0  ;;  %v429_v37 = vld [vmem:[#allocation2 + $0x38] sm:$0xff] }
 0x214   : > { %v2726_v43 = vadd.f32 %v2725_v41, %v2724_v38  ;;  %v2837_v44 = vpop.f32.mrb[3].mxu1 }
 0x215   : > { %v1290_v45 = vadd.f32 %v2835_v39, %v2723_v36  ;;  %v2838_v46 = vadd.f32 %v2837_v44, %v2836_v40 }
 0x217   : > { %v1416_v48 = vadd.f32 %v1290_v45, %v422_v42  ;;  %v1293_v49 = vadd.f32 %v2838_v46, %v2726_v43 }
 0x218   : > { %v2727_v50 = vpop.f32.mrb[4].mxu0 }
 0x219   : > { %1448 = vst [vmem:[#allocation2] sm:$0xff] %v1416_v48  ;;  %v1417_v51 = vadd.f32 %v1293_v49, %v423_v47  ;;  %v2839_v52 = vpop.f32.mrb[4].mxu1  ;;  %v2728_v53 = vpop.f32.mrb[5].mxu0 }
 0x21a   : > { %v2729_v54 = vadd.f32 %v2728_v53, %v2727_v50  ;;  %v2840_v55 = vpop.f32.mrb[5].mxu1  ;;  %v2730_v56 = vpop.f32.mrb[6].mxu0  ;;  %v430_v50 = vld [vmem:[#allocation2 + $0x40] sm:$0xff] }
 0x21b   : > { %1449 = vst [vmem:[#allocation2 + $0x8] sm:$0xff] %v1417_v51  ;;  %v2841_v57 = vadd.f32 %v2840_v55, %v2839_v52  ;;  %v2842_v58 = vpop.f32.mrb[6].mxu1  ;;  %v2731_v59 = vpop.f32.mrb[7].mxu0  ;;  %v431_v55 = vld [vmem:[#allocation2 + $0x48] sm:$0xff] }
 0x21c   : > { %v2732_v61 = vadd.f32 %v2731_v59, %v2730_v56  ;;  %v2843_v62 = vpop.f32.mrb[7].mxu1 }
 0x21d   : > { %v1298_v63 = vadd.f32 %v2841_v57, %v2729_v54  ;;  %v2844_v0 = vadd.f32 %v2843_v62, %v2842_v58 }
 0x21f   : > { %v1418_v2 = vadd.f32 %v1298_v63, %v424_v60  ;;  %v1301_v3 = vadd.f32 %v2844_v0, %v2732_v61 }
 0x220   : > { %v2733_v4 = vpop.f32.mrb[8].mxu0 }
 0x221   : > { %1450 = vst [vmem:[#allocation2 + $0x10] sm:$0xff] %v1418_v2  ;;  %v1419_v5 = vadd.f32 %v1301_v3, %v425_v1  ;;  %v2845_v6 = vpop.f32.mrb[8].mxu1  ;;  %v2734_v7 = vpop.f32.mrb[9].mxu0 }
 0x222   : > { %v2735_v8 = vadd.f32 %v2734_v7, %v2733_v4  ;;  %v2846_v9 = vpop.f32.mrb[9].mxu1  ;;  %v2736_v10 = vpop.f32.mrb[10].mxu0  ;;  %v432_v4 = vld [vmem:[#allocation2 + $0x50] sm:$0xff] }
 0x223   : > { %1451 = vst [vmem:[#allocation2 + $0x18] sm:$0xff] %v1419_v5  ;;  %v2847_v11 = vadd.f32 %v2846_v9, %v2845_v6  ;;  %v2848_v12 = vpop.f32.mrb[10].mxu1  ;;  %v2737_v13 = vpop.f32.mrb[11].mxu0  ;;  %v433_v9 = vld [vmem:[#allocation2 + $0x58] sm:$0xff] }
 0x224   : > { %v2738_v15 = vadd.f32 %v2737_v13, %v2736_v10  ;;  %v2849_v16 = vpop.f32.mrb[11].mxu1 }
 0x225   : > { %v1306_v17 = vadd.f32 %v2847_v11, %v2735_v8  ;;  %v2850_v18 = vadd.f32 %v2849_v16, %v2848_v12 }
 0x227   : > { %v1420_v20 = vadd.f32 %v1306_v17, %v426_v14  ;;  %v1309_v21 = vadd.f32 %v2850_v18, %v2738_v15 }
 0x228   : > { %v2739_v22 = vpop.f32.mrb[12].mxu0 }
 0x229   : > { %1452 = vst [vmem:[#allocation2 + $0x20] sm:$0xff] %v1420_v20  ;;  %v1421_v23 = vadd.f32 %v1309_v21, %v427_v19  ;;  %v2851_v24 = vpop.f32.mrb[12].mxu1  ;;  %v2740_v25 = vpop.f32.mrb[13].mxu0 }
 0x22a   : > { %v2741_v26 = vadd.f32 %v2740_v25, %v2739_v22  ;;  %v2852_v27 = vpop.f32.mrb[13].mxu1  ;;  %v2742_v28 = vpop.f32.mrb[14].mxu0  ;;  %v434_v22 = vld [vmem:[#allocation2 + $0x60] sm:$0xff] }
 0x22b   : > { %1453 = vst [vmem:[#allocation2 + $0x28] sm:$0xff] %v1421_v23  ;;  %v2853_v29 = vadd.f32 %v2852_v27, %v2851_v24  ;;  %v2854_v30 = vpop.f32.mrb[14].mxu1  ;;  %v2743_v31 = vpop.f32.mrb[15].mxu0  ;;  %v435_v27 = vld [vmem:[#allocation2 + $0x68] sm:$0xff] }
 0x22c   : > { %v2744_v33 = vadd.f32 %v2743_v31, %v2742_v28  ;;  %v2855_v34 = vpop.f32.mrb[15].mxu1 }
 0x22d   : > { %v1314_v35 = vadd.f32 %v2853_v29, %v2741_v26  ;;  %v2856_v36 = vadd.f32 %v2855_v34, %v2854_v30 }
 0x22f   : > { %v1422_v38 = vadd.f32 %v1314_v35, %v428_v32  ;;  %v1317_v39 = vadd.f32 %v2856_v36, %v2744_v33 }
 0x230   : > { %v2745_v40 = vpop.f32.mrb[16].mxu0 }
 0x231   : > { %1454 = vst [vmem:[#allocation2 + $0x30] sm:$0xff] %v1422_v38  ;;  %v1423_v41 = vadd.f32 %v1317_v39, %v429_v37  ;;  %v2857_v42 = vpop.f32.mrb[16].mxu1  ;;  %v2746_v43 = vpop.f32.mrb[17].mxu0 }
 0x232   : > { %v2747_v44 = vadd.f32 %v2746_v43, %v2745_v40  ;;  %v2858_v45 = vpop.f32.mrb[17].mxu1  ;;  %v2748_v46 = vpop.f32.mrb[18].mxu0  ;;  %v436_v40 = vld [vmem:[#allocation2 + $0x70] sm:$0xff] }
 0x233   : > { %1455 = vst [vmem:[#allocation2 + $0x38] sm:$0xff] %v1423_v41  ;;  %v2859_v47 = vadd.f32 %v2858_v45, %v2857_v42  ;;  %v2860_v48 = vpop.f32.mrb[18].mxu1  ;;  %v2749_v49 = vpop.f32.mrb[19].mxu0  ;;  %v437_v45 = vld [vmem:[#allocation2 + $0x78] sm:$0xff] }
 0x234   : > { %v2750_v51 = vadd.f32 %v2749_v49, %v2748_v46  ;;  %v2861_v52 = vpop.f32.mrb[19].mxu1 }
 0x235   : > { %v1322_v53 = vadd.f32 %v2859_v47, %v2747_v44  ;;  %v2862_v54 = vadd.f32 %v2861_v52, %v2860_v48 }
 0x237   : > { %v1424_v56 = vadd.f32 %v1322_v53, %v430_v50  ;;  %v1325_v57 = vadd.f32 %v2862_v54, %v2750_v51 }
 0x238   : > { %v2751_v58 = vpop.f32.mrb[20].mxu0 }
 0x239   : > { %1456 = vst [vmem:[#allocation2 + $0x40] sm:$0xff] %v1424_v56  ;;  %v1425_v59 = vadd.f32 %v1325_v57, %v431_v55  ;;  %v2863_v60 = vpop.f32.mrb[20].mxu1  ;;  %v2752_v61 = vpop.f32.mrb[21].mxu0 }
 0x23a   : > { %v2753_v62 = vadd.f32 %v2752_v61, %v2751_v58  ;;  %v2864_v63 = vpop.f32.mrb[21].mxu1  ;;  %v2754_v0 = vpop.f32.mrb[22].mxu0  ;;  %v438_v58 = vld [vmem:[#allocation2 + $0x80] sm:$0xff] }
 0x23b   : > { %1457 = vst [vmem:[#allocation2 + $0x48] sm:$0xff] %v1425_v59  ;;  %v2865_v1 = vadd.f32 %v2864_v63, %v2863_v60  ;;  %v2866_v2 = vpop.f32.mrb[22].mxu1  ;;  %v2755_v3 = vpop.f32.mrb[23].mxu0  ;;  %v439_v63 = vld [vmem:[#allocation2 + $0x88] sm:$0xff] }
 0x23c   : > { %v2756_v5 = vadd.f32 %v2755_v3, %v2754_v0  ;;  %v2867_v6 = vpop.f32.mrb[23].mxu1 }
 0x23d   : > { %v1330_v7 = vadd.f32 %v2865_v1, %v2753_v62  ;;  %v2868_v8 = vadd.f32 %v2867_v6, %v2866_v2 }
 0x23f   : > { %v1426_v10 = vadd.f32 %v1330_v7, %v432_v4  ;;  %v1333_v11 = vadd.f32 %v2868_v8, %v2756_v5 }
 0x240   : > { %v2757_v12 = vpop.f32.mrb[24].mxu0 }
 0x241   : > { %1458 = vst [vmem:[#allocation2 + $0x50] sm:$0xff] %v1426_v10  ;;  %v1427_v13 = vadd.f32 %v1333_v11, %v433_v9  ;;  %v2869_v14 = vpop.f32.mrb[24].mxu1  ;;  %v2758_v15 = vpop.f32.mrb[25].mxu0 }
 0x242   : > { %v2759_v16 = vadd.f32 %v2758_v15, %v2757_v12  ;;  %v2870_v17 = vpop.f32.mrb[25].mxu1  ;;  %v2760_v18 = vpop.f32.mrb[26].mxu0  ;;  %v440_v12 = vld [vmem:[#allocation2 + $0x90] sm:$0xff] }
 0x243   : > { %1459 = vst [vmem:[#allocation2 + $0x58] sm:$0xff] %v1427_v13  ;;  %v2871_v19 = vadd.f32 %v2870_v17, %v2869_v14  ;;  %v2872_v20 = vpop.f32.mrb[26].mxu1  ;;  %v2761_v21 = vpop.f32.mrb[27].mxu0  ;;  %v441_v17 = vld [vmem:[#allocation2 + $0x98] sm:$0xff] }
 0x244   : > { %v2762_v23 = vadd.f32 %v2761_v21, %v2760_v18  ;;  %v2873_v24 = vpop.f32.mrb[27].mxu1 }
 0x245   : > { %v1338_v25 = vadd.f32 %v2871_v19, %v2759_v16  ;;  %v2874_v26 = vadd.f32 %v2873_v24, %v2872_v20 }
 0x247   : > { %v1428_v28 = vadd.f32 %v1338_v25, %v434_v22  ;;  %v1341_v29 = vadd.f32 %v2874_v26, %v2762_v23 }
 0x248   : > { %v2763_v30 = vpop.f32.mrb[28].mxu0 }
 0x249   : > { %1460 = vst [vmem:[#allocation2 + $0x60] sm:$0xff] %v1428_v28  ;;  %v1429_v31 = vadd.f32 %v1341_v29, %v435_v27  ;;  %v2875_v32 = vpop.f32.mrb[28].mxu1  ;;  %v2764_v33 = vpop.f32.mrb[29].mxu0 }
 0x24a   : > { %v2765_v34 = vadd.f32 %v2764_v33, %v2763_v30  ;;  %v2876_v35 = vpop.f32.mrb[29].mxu1  ;;  %v2766_v36 = vpop.f32.mrb[30].mxu0  ;;  %v442_v30 = vld [vmem:[#allocation2 + $0xa0] sm:$0xff] }
 0x24b   : > { %1461 = vst [vmem:[#allocation2 + $0x68] sm:$0xff] %v1429_v31  ;;  %v2877_v37 = vadd.f32 %v2876_v35, %v2875_v32  ;;  %v2878_v38 = vpop.f32.mrb[30].mxu1  ;;  %v2767_v39 = vpop.f32.mrb[31].mxu0  ;;  %v443_v35 = vld [vmem:[#allocation2 + $0xa8] sm:$0xff] }
 0x24c   : > { %v2768_v41 = vadd.f32 %v2767_v39, %v2766_v36  ;;  %v2879_v42 = vpop.f32.mrb[31].mxu1 }
 0x24d   : > { %v1346_v43 = vadd.f32 %v2877_v37, %v2765_v34  ;;  %v2880_v44 = vadd.f32 %v2879_v42, %v2878_v38 }
 0x24f   : > { %v1430_v46 = vadd.f32 %v1346_v43, %v436_v40  ;;  %v1349_v47 = vadd.f32 %v2880_v44, %v2768_v41 }
 0x250   : > { %v2769_v48 = vpop.f32.mrb[32].mxu0 }
 0x251   : > { %1462 = vst [vmem:[#allocation2 + $0x70] sm:$0xff] %v1430_v46  ;;  %v1431_v49 = vadd.f32 %v1349_v47, %v437_v45  ;;  %v2881_v50 = vpop.f32.mrb[32].mxu1  ;;  %v2770_v51 = vpop.f32.mrb[33].mxu0 }
 0x252   : > { %v2771_v52 = vadd.f32 %v2770_v51, %v2769_v48  ;;  %v2882_v53 = vpop.f32.mrb[33].mxu1  ;;  %v2772_v54 = vpop.f32.mrb[34].mxu0  ;;  %v444_v48 = vld [vmem:[#allocation2 + $0xb0] sm:$0xff] }
 0x253   : > { %1463 = vst [vmem:[#allocation2 + $0x78] sm:$0xff] %v1431_v49  ;;  %v2883_v55 = vadd.f32 %v2882_v53, %v2881_v50  ;;  %v2884_v56 = vpop.f32.mrb[34].mxu1  ;;  %v2773_v57 = vpop.f32.mrb[35].mxu0  ;;  %v445_v53 = vld [vmem:[#allocation2 + $0xb8] sm:$0xff] }
 0x254   : > { %v2774_v59 = vadd.f32 %v2773_v57, %v2772_v54  ;;  %v2885_v60 = vpop.f32.mrb[35].mxu1 }
 0x255   : > { %v1354_v61 = vadd.f32 %v2883_v55, %v2771_v52  ;;  %v2886_v62 = vadd.f32 %v2885_v60, %v2884_v56 }
 0x257   : > { %v1432_v0 = vadd.f32 %v1354_v61, %v438_v58  ;;  %v1357_v1 = vadd.f32 %v2886_v62, %v2774_v59 }
 0x258   : > { %v2775_v2 = vpop.f32.mrb[36].mxu0 }
 0x259   : > { %1464 = vst [vmem:[#allocation2 + $0x80] sm:$0xff] %v1432_v0  ;;  %v1433_v3 = vadd.f32 %v1357_v1, %v439_v63  ;;  %v2887_v4 = vpop.f32.mrb[36].mxu1  ;;  %v2776_v5 = vpop.f32.mrb[37].mxu0 }
 0x25a   : > { %v2777_v6 = vadd.f32 %v2776_v5, %v2775_v2  ;;  %v2888_v7 = vpop.f32.mrb[37].mxu1  ;;  %v2778_v8 = vpop.f32.mrb[38].mxu0  ;;  %v446_v2 = vld [vmem:[#allocation2 + $0xc0] sm:$0xff] }
 0x25b   : > { %1465 = vst [vmem:[#allocation2 + $0x88] sm:$0xff] %v1433_v3  ;;  %v2889_v9 = vadd.f32 %v2888_v7, %v2887_v4  ;;  %v2890_v10 = vpop.f32.mrb[38].mxu1  ;;  %v2779_v11 = vpop.f32.mrb[39].mxu0  ;;  %v447_v7 = vld [vmem:[#allocation2 + $0xc8] sm:$0xff] }
 0x25c   : > { %v2780_v13 = vadd.f32 %v2779_v11, %v2778_v8  ;;  %v2891_v14 = vpop.f32.mrb[39].mxu1 }
 0x25d   : > { %v1362_v15 = vadd.f32 %v2889_v9, %v2777_v6  ;;  %v2892_v16 = vadd.f32 %v2891_v14, %v2890_v10 }
 0x25f   : > { %v1434_v18 = vadd.f32 %v1362_v15, %v440_v12  ;;  %v1365_v19 = vadd.f32 %v2892_v16, %v2780_v13 }
 0x260   : > { %v2781_v20 = vpop.f32.mrb[40].mxu0 }
 0x261   : > { %1466 = vst [vmem:[#allocation2 + $0x90] sm:$0xff] %v1434_v18  ;;  %v1435_v21 = vadd.f32 %v1365_v19, %v441_v17  ;;  %v2893_v22 = vpop.f32.mrb[40].mxu1  ;;  %v2782_v23 = vpop.f32.mrb[41].mxu0 }
 0x262   : > { %v2783_v24 = vadd.f32 %v2782_v23, %v2781_v20  ;;  %v2894_v25 = vpop.f32.mrb[41].mxu1  ;;  %v2784_v26 = vpop.f32.mrb[42].mxu0  ;;  %v448_v20 = vld [vmem:[#allocation2 + $0xd0] sm:$0xff] }
 0x263   : > { %1467 = vst [vmem:[#allocation2 + $0x98] sm:$0xff] %v1435_v21  ;;  %v2895_v27 = vadd.f32 %v2894_v25, %v2893_v22  ;;  %v2896_v28 = vpop.f32.mrb[42].mxu1  ;;  %v2785_v29 = vpop.f32.mrb[43].mxu0  ;;  %v449_v25 = vld [vmem:[#allocation2 + $0xd8] sm:$0xff] }
 0x264   : > { %v2786_v31 = vadd.f32 %v2785_v29, %v2784_v26  ;;  %v2897_v32 = vpop.f32.mrb[43].mxu1 }
 0x265   : > { %v1370_v33 = vadd.f32 %v2895_v27, %v2783_v24  ;;  %v2898_v34 = vadd.f32 %v2897_v32, %v2896_v28 }
 0x267   : > { %v1436_v36 = vadd.f32 %v1370_v33, %v442_v30  ;;  %v1373_v37 = vadd.f32 %v2898_v34, %v2786_v31 }
 0x268   : > { %v2787_v38 = vpop.f32.mrb[44].mxu0 }
 0x269   : > { %1468 = vst [vmem:[#allocation2 + $0xa0] sm:$0xff] %v1436_v36  ;;  %v1437_v39 = vadd.f32 %v1373_v37, %v443_v35  ;;  %v2899_v40 = vpop.f32.mrb[44].mxu1  ;;  %v2788_v41 = vpop.f32.mrb[45].mxu0 }
 0x26a   : > { %v2789_v42 = vadd.f32 %v2788_v41, %v2787_v38  ;;  %v2900_v43 = vpop.f32.mrb[45].mxu1  ;;  %v2790_v44 = vpop.f32.mrb[46].mxu0  ;;  %v450_v38 = vld [vmem:[#allocation2 + $0xe0] sm:$0xff] }
 0x26b   : > { %1469 = vst [vmem:[#allocation2 + $0xa8] sm:$0xff] %v1437_v39  ;;  %v2901_v45 = vadd.f32 %v2900_v43, %v2899_v40  ;;  %v2902_v46 = vpop.f32.mrb[46].mxu1  ;;  %v2791_v47 = vpop.f32.mrb[47].mxu0  ;;  %v451_v43 = vld [vmem:[#allocation2 + $0xe8] sm:$0xff] }
 0x26c   : > { %v2792_v49 = vadd.f32 %v2791_v47, %v2790_v44  ;;  %v2903_v50 = vpop.f32.mrb[47].mxu1 }
 0x26d   : > { %v1378_v51 = vadd.f32 %v2901_v45, %v2789_v42  ;;  %v2904_v52 = vadd.f32 %v2903_v50, %v2902_v46 }
 0x26f   : > { %v1438_v54 = vadd.f32 %v1378_v51, %v444_v48  ;;  %v1381_v55 = vadd.f32 %v2904_v52, %v2792_v49 }
 0x270   : > { %v2793_v56 = vpop.f32.mrb[48].mxu0 }
 0x271   : > { %1470 = vst [vmem:[#allocation2 + $0xb0] sm:$0xff] %v1438_v54  ;;  %v1439_v57 = vadd.f32 %v1381_v55, %v445_v53  ;;  %v2905_v58 = vpop.f32.mrb[48].mxu1  ;;  %v2794_v59 = vpop.f32.mrb[49].mxu0 }
 0x272   : > { %v2795_v60 = vadd.f32 %v2794_v59, %v2793_v56  ;;  %v2906_v61 = vpop.f32.mrb[49].mxu1  ;;  %v2796_v62 = vpop.f32.mrb[50].mxu0  ;;  %v452_v56 = vld [vmem:[#allocation2 + $0xf0] sm:$0xff] }
 0x273   : > { %1471 = vst [vmem:[#allocation2 + $0xb8] sm:$0xff] %v1439_v57  ;;  %v2907_v63 = vadd.f32 %v2906_v61, %v2905_v58  ;;  %v2908_v0 = vpop.f32.mrb[50].mxu1  ;;  %v2797_v1 = vpop.f32.mrb[51].mxu0  ;;  %v453_v61 = vld [vmem:[#allocation2 + $0xf8] sm:$0xff] }
 0x274   : > { %v2798_v3 = vadd.f32 %v2797_v1, %v2796_v62  ;;  %v2909_v4 = vpop.f32.mrb[51].mxu1  ;;  %v3381_v1 = vld [vmem:[#allocation8] sm:$0xff] (!%p2519_p6)  }
 0x275   : > { %v1386_v5 = vadd.f32 %v2907_v63, %v2795_v60  ;;  %v2910_v6 = vadd.f32 %v2909_v4, %v2908_v0  ;;  %2977 = vmatprep.subr.bf16.mxu0 (!%p2519_p6), %v3381_v1  ;;  %v3384_v4 = vld [vmem:[#allocation8 + $0x18] sm:$0xff] (!%p2519_p6)  }
 0x276   : > { %2978 = vmatpush3.bf16.msra.mxu0 (!%p2519_p6), %v3381_v1  ;;  %v4255_v1 = vld [vmem:[#allocation9] ss:$0 sm:$0xff] (!%p2519_p6) }
 0x277   : > { %v1440_v8 = vadd.f32 %v1386_v5, %v446_v2  ;;  %v1389_v9 = vadd.f32 %v2910_v6, %v2798_v3  ;;  %v3382_v2 = vld [vmem:[#allocation8 + $0x8] sm:$0xff] (!%p2519_p6)   ;;  %v3383_v3 = vld [vmem:[#allocation8 + $0x10] sm:$0xff] (!%p2519_p6)   ;;  %v1484_v5 = vld [vmem:[#allocation2] sm:$0xff] (!%p2519_p6) }
 0x278   : > { %v2799_v10 = vpop.f32.mrb[52].mxu0  ;;  %2979 = vmatprep.subr.bf16.mxu0 (!%p2519_p6), %v3382_v2  ;;  %v1485_v6 = vld [vmem:[#allocation2 + $0x8] sm:$0xff] (!%p2519_p6) }
 0x279   : > { %1472 = vst [vmem:[#allocation2 + $0xc0] sm:$0xff] %v1440_v8  ;;  %v1441_v11 = vadd.f32 %v1389_v9, %v447_v7  ;;  %v2911_v12 = vpop.f32.mrb[52].mxu1  ;;  %v2800_v13 = vpop.f32.mrb[53].mxu0  ;;  %v1533_v7 = vpack.c.bf16 (!%p2519_p6), %v1485_v6, %v1484_v5  ;;  %v3385_v8 = vld [vmem:[#allocation8 + $0x20] sm:$0xff] (!%p2519_p6)   ;;  %v3386_v9 = vld [vmem:[#allocation8 + $0x28] sm:$0xff] (!%p2519_p6)  }
 0x27a   : > { %v2801_v14 = vadd.f32 %v2800_v13, %v2799_v10  ;;  %v2912_v15 = vpop.f32.mrb[53].mxu1  ;;  %v2802_v16 = vpop.f32.mrb[54].mxu0  ;;  %2980 = vmatpush3.bf16.msra.mxu0 (!%p2519_p6), %v3382_v2  ;;  %v3387_v10 = vld [vmem:[#allocation8 + $0x30] sm:$0xff] (!%p2519_p6)  }
 0x27b   : > { %1473 = vst [vmem:[#allocation2 + $0xc8] sm:$0xff] %v1441_v11  ;;  %v2913_v17 = vadd.f32 %v2912_v15, %v2911_v12  ;;  %v2914_v18 = vpop.f32.mrb[54].mxu1  ;;  %v2803_v19 = vpop.f32.mrb[55].mxu0  ;;  %2981 = vmatprep.subr.bf16.mxu0 (!%p2519_p6), %v3383_v3  ;;  %2993 = vmatprep.mubr.bf16.mxu0 (!%p2519_p6), %v1533_v7  ;;  %v3389_v11 = vld [vmem:[#allocation11] sm:$0xff] (!%p2519_p6)   ;;  %v3390_v12 = vld [vmem:[#allocation11 + $0x8] sm:$0xff] (!%p2519_p6)   ;;  %v3391_v13 = vld [vmem:[#allocation11 + $0x10] sm:$0xff] (!%p2519_p6)  }
 0x27c   : > { %v2804_v21 = vadd.f32 %v2803_v19, %v2802_v16  ;;  %v2915_v22 = vpop.f32.mrb[55].mxu1  ;;  %3025 = vmatprep.subr.bf16.mxu1 (!%p2519_p6), %v3389_v11  ;;  %v1486_v15 = vld [vmem:[#allocation2 + $0x10] sm:$0xff] (!%p2519_p6)  ;;  %v1487_v16 = vld [vmem:[#allocation2 + $0x18] sm:$0xff] (!%p2519_p6)  ;;  %v1489_v19 = vld [vmem:[#allocation2 + $0x28] sm:$0xff] (!%p2519_p6) }
 0x27d   : > { %v1394_v23 = vadd.f32 %v2913_v17, %v2801_v14  ;;  %v2916_v24 = vadd.f32 %v2915_v22, %v2914_v18  ;;  %3026 = vmatpush3.bf16.msra.mxu1 (!%p2519_p6), %v3389_v11  ;;  %v3388_v14 = vld [vmem:[#allocation8 + $0x38] sm:$0xff] (!%p2519_p6)   ;;  %v1488_v18 = vld [vmem:[#allocation2 + $0x20] sm:$0xff] (!%p2519_p6) }
 0x27e   : > { %2982 = vmatpush3.bf16.msra.mxu0 (!%p2519_p6), %v3383_v3  ;;  %3027 = vmatprep.subr.bf16.mxu1 (!%p2519_p6), %v3390_v12  ;;  %v3392_v17 = vld [vmem:[#allocation11 + $0x18] sm:$0xff] (!%p2519_p6)   ;;  %v3393_v22 = vld [vmem:[#allocation11 + $0x20] sm:$0xff] (!%p2519_p6)  }
 0x27f   : > { %v1442_v26 = vadd.f32 %v1394_v23, %v448_v20  ;;  %v1397_v27 = vadd.f32 %v2916_v24, %v2804_v21  ;;  %2983 = vmatprep.subr.bf16.mxu0 (!%p2519_p6), %v3384_v4  ;;  %v1534_v20 = vpack.c.bf16 (!%p2519_p6), %v1487_v16, %v1486_v15  ;;  %v1535_v21 = vpack.c.bf16 (!%p2519_p6), %v1489_v19, %v1488_v18  ;;  %v1490_v23 = vld [vmem:[#allocation2 + $0x30] sm:$0xff] (!%p2519_p6)  ;;  %v1491_v24 = vld [vmem:[#allocation2 + $0x38] sm:$0xff] (!%p2519_p6) }
 0x280   : > { %v2805_v28 = vpop.f32.mrb[56].mxu0 }
 0x281   : > { %1474 = vst [vmem:[#allocation2 + $0xd0] sm:$0xff] %v1442_v26  ;;  %v1443_v29 = vadd.f32 %v1397_v27, %v449_v25  ;;  %v2917_v30 = vpop.f32.mrb[56].mxu1  ;;  %v2806_v31 = vpop.f32.mrb[57].mxu0  ;;  %3028 = vmatpush3.bf16.msra.mxu1 (!%p2519_p6), %v3390_v12  ;;  %v3394_v25 = vld [vmem:[#allocation11 + $0x28] sm:$0xff] (!%p2519_p6)   ;;  %v1492_v26 = vld [vmem:[#allocation2 + $0x40] sm:$0xff] (!%p2519_p6) }
 0x282   : > { %v2807_v32 = vadd.f32 %v2806_v31, %v2805_v28  ;;  %v2918_v33 = vpop.f32.mrb[57].mxu1  ;;  %v2808_v34 = vpop.f32.mrb[58].mxu0  ;;  %2984 = vmatpush3.bf16.msra.mxu0 (!%p2519_p6), %v3384_v4  ;;  %3029 = vmatprep.subr.bf16.mxu1 (!%p2519_p6), %v3391_v13  ;;  %v1493_v27 = vld [vmem:[#allocation2 + $0x48] sm:$0xff] (!%p2519_p6)  ;;  %v1536_v28 = vpack.c.bf16 (!%p2519_p6), %v1491_v24, %v1490_v23  ;;  %v1495_v31 = vld [vmem:[#allocation2 + $0x58] sm:$0xff] (!%p2519_p6) }
 0x283   : > { %1475 = vst [vmem:[#allocation2 + $0xd8] sm:$0xff] %v1443_v29  ;;  %v2919_v35 = vadd.f32 %v2918_v33, %v2917_v30  ;;  %v2920_v36 = vpop.f32.mrb[58].mxu1  ;;  %v2809_v37 = vpop.f32.mrb[59].mxu0  ;;  %2985 = vmatprep.subr.bf16.mxu0 (!%p2519_p6), %v3385_v8  ;;  %v1537_v29 = vpack.c.bf16 (!%p2519_p6), %v1493_v27, %v1492_v26  ;;  %v1494_v30 = vld [vmem:[#allocation2 + $0x50] sm:$0xff] (!%p2519_p6)  ;;  %v1497_v33 = vld [vmem:[#allocation2 + $0x68] sm:$0xff] (!%p2519_p6) }
 0x284   : > { %v2810_v39 = vadd.f32 %v2809_v37, %v2808_v34  ;;  %v2921_v40 = vpop.f32.mrb[59].mxu1  ;;  %v1538_v34 = vpack.c.bf16 (!%p2519_p6), %v1495_v31, %v1494_v30  ;;  %v1499_v37 = vld [vmem:[#allocation2 + $0x78] sm:$0xff] (!%p2519_p6) }
 0x285   : > { %v1402_v41 = vadd.f32 %v2919_v35, %v2807_v32  ;;  %v2922_v42 = vadd.f32 %v2921_v40, %v2920_v36  ;;  %3030 = vmatpush3.bf16.msra.mxu1 (!%p2519_p6), %v3391_v13  ;;  %v1496_v32 = vld [vmem:[#allocation2 + $0x60] sm:$0xff] (!%p2519_p6)  ;;  %v1498_v36 = vld [vmem:[#allocation2 + $0x70] sm:$0xff] (!%p2519_p6) }
 0x286   : > { %2986 = vmatpush3.bf16.msra.mxu0 (!%p2519_p6), %v3385_v8  ;;  %3031 = vmatprep.subr.bf16.mxu1 (!%p2519_p6), %v3392_v17  ;;  %v1539_v35 = vpack.c.bf16 (!%p2519_p6), %v1497_v33, %v1496_v32  ;;  %v1540_v40 = vpack.c.bf16 (!%p2519_p6), %v1499_v37, %v1498_v36 }
 0x287   : > { %v1444_v44 = vadd.f32 %v1402_v41, %v450_v38  ;;  %v1405_v45 = vadd.f32 %v2922_v42, %v2810_v39  ;;  %2987 = vmatprep.subr.bf16.mxu0 (!%p2519_p6), %v3386_v9  ;;  %v1500_v38 = vld [vmem:[#allocation2 + $0x80] sm:$0xff] (!%p2519_p6)  ;;  %v1501_v39 = vld [vmem:[#allocation2 + $0x88] sm:$0xff] (!%p2519_p6)  ;;  %v1502_v42 = vld [vmem:[#allocation2 + $0x90] sm:$0xff] (!%p2519_p6) }
 0x288   : > { %v2811_v46 = vpop.f32.mrb[60].mxu0  ;;  %v1541_v41 = vpack.c.bf16 (!%p2519_p6), %v1501_v39, %v1500_v38 }
 0x289   : > { %1476 = vst [vmem:[#allocation2 + $0xe0] sm:$0xff] %v1444_v44  ;;  %v1445_v47 = vadd.f32 %v1405_v45, %v451_v43  ;;  %v2923_v48 = vpop.f32.mrb[60].mxu1  ;;  %v2812_v49 = vpop.f32.mrb[61].mxu0  ;;  %3032 = vmatpush3.bf16.msra.mxu1 (!%p2519_p6), %v3392_v17  ;;  %v1503_v43 = vld [vmem:[#allocation2 + $0x98] sm:$0xff] (!%p2519_p6)  ;;  %v1504_v44 = vld [vmem:[#allocation2 + $0xa0] sm:$0xff] (!%p2519_p6)  ;;  %v1505_v45 = vld [vmem:[#allocation2 + $0xa8] sm:$0xff] (!%p2519_p6) }
 0x28a   : > { %v2813_v50 = vadd.f32 %v2812_v49, %v2811_v46  ;;  %v2924_v51 = vpop.f32.mrb[61].mxu1  ;;  %v2814_v52 = vpop.f32.mrb[62].mxu0  ;;  %2988 = vmatpush3.bf16.msra.mxu0 (!%p2519_p6), %v3386_v9  ;;  %3033 = vmatprep.subr.bf16.mxu1 (!%p2519_p6), %v3393_v22  ;;  %v1542_v46 = vpack.c.bf16 (!%p2519_p6), %v1503_v43, %v1502_v42  ;;  %v1507_v49 = vld [vmem:[#allocation2 + $0xb8] sm:$0xff] (!%p2519_p6) }
 0x28b   : > { %1477 = vst [vmem:[#allocation2 + $0xe8] sm:$0xff] %v1445_v47  ;;  %v2925_v53 = vadd.f32 %v2924_v51, %v2923_v48  ;;  %v2926_v54 = vpop.f32.mrb[62].mxu1  ;;  %v2815_v55 = vpop.f32.mrb[63].mxu0  ;;  %2989 = vmatprep.subr.bf16.mxu0 (!%p2519_p6), %v3387_v10  ;;  %v1543_v47 = vpack.c.bf16 (!%p2519_p6), %v1505_v45, %v1504_v44  ;;  %v1506_v48 = vld [vmem:[#allocation2 + $0xb0] sm:$0xff] (!%p2519_p6)  ;;  %v1509_v51 = vld [vmem:[#allocation2 + $0xc8] sm:$0xff] (!%p2519_p6) }
 0x28c   : > { %v2816_v57 = vadd.f32 %v2815_v55, %v2814_v52  ;;  %v2927_v58 = vpop.f32.mrb[63].mxu1  ;;  %v1544_v52 = vpack.c.bf16 (!%p2519_p6), %v1507_v49, %v1506_v48  ;;  %v1511_v55 = vld [vmem:[#allocation2 + $0xd8] sm:$0xff] (!%p2519_p6) }
 0x28d   : > { %v1410_v59 = vadd.f32 %v2925_v53, %v2813_v50  ;;  %v2928_v60 = vadd.f32 %v2927_v58, %v2926_v54  ;;  %1483 = sbr.rel (%p2519_p6) target bundleno = 1161 (0x489), region = 76  ;;  %3034 = vmatpush3.bf16.msra.mxu1 (!%p2519_p6), %v3393_v22  ;;  %v1508_v50 = vld [vmem:[#allocation2 + $0xc0] sm:$0xff] (!%p2519_p6)  ;;  %v1510_v54 = vld [vmem:[#allocation2 + $0xd0] sm:$0xff] (!%p2519_p6) }
 0x28e   : > { %2990 = vmatpush3.bf16.msra.mxu0 (!%p2519_p6), %v3387_v10  ;;  %3035 = vmatprep.subr.bf16.mxu1 (!%p2519_p6), %v3394_v25  ;;  %v1545_v53 = vpack.c.bf16 (!%p2519_p6), %v1509_v51, %v1508_v50  ;;  %v1546_v58 = vpack.c.bf16 (!%p2519_p6), %v1511_v55, %v1510_v54 }
 0x28f   : > { %v1446_v62 = vadd.f32 %v1410_v59, %v452_v56  ;;  %v1413_v63 = vadd.f32 %v2928_v60, %v2816_v57  ;;  %2991 = vmatprep.subr.bf16.mxu0 (!%p2519_p6), %v3388_v14 }
 0x290   : > { %v1512_v56 = vld [vmem:[#allocation2 + $0xe0] sm:$0xff] (!%p2519_p6) }
 0x291   : > { %1478 = vst [vmem:[#allocation2 + $0xf0] sm:$0xff] %v1446_v62  ;;  %v1447_v0 = vadd.f32 %v1413_v63, %v453_v61  ;;  %3036 = vmatpush3.bf16.msra.mxu1 (!%p2519_p6), %v3394_v25  ;;  %v3395_v63 = vld [vmem:[#allocation11 + $0x30] sm:$0xff] (!%p2519_p6)  }
 0x292   : > { %2992 = vmatpush3.bf16.msra.mxu0 (!%p2519_p6), %v3388_v14  ;;  %v1513_v57 = vld [vmem:[#allocation2 + $0xe8] sm:$0xff] (!%p2519_p6)  ;;  %3037 = vmatprep.subr.bf16.mxu1 (!%p2519_p6), %v3395_v63 }
 0x293   : > { %1479 = vst [vmem:[#allocation2 + $0xf8] sm:$0xff] %v1447_v0  ;;  %v1547_v59 = vpack.c.bf16 (!%p2519_p6), %v1513_v57, %v1512_v56  ;;  %v3396_v0 = vld [vmem:[#allocation11 + $0x38] sm:$0xff] (!%p2519_p6)  }
 0x295   : > { %2994 = vmatmul.mubr.bf16.vlgmr.msra.gmra.mrb[0].mxu0 %v1534_v20  ;;  %3038 = vmatpush3.bf16.msra.mxu1 %v3395_v63 }
 0x296   : > { %2997 = vmatprep.mubr.bf16.mxu0 %v1535_v21  ;;  %3039 = vmatprep.subr.bf16.mxu1 %v3396_v0 }
 0x298   : > { %v1514_v60 = vld [vmem:[#allocation2 + $0xf0] sm:$0xff] }
 0x299   : > { %3040 = vmatpush3.bf16.msra.mxu1 %v3396_v0 }
 0x29a   : > { %v1515_v61 = vld [vmem:[#allocation2 + $0xf8] sm:$0xff] }
 0x29b   : > { %v1548_v62 = vpack.c.bf16 %v1515_v61, %v1514_v60 }
 0x29d   : > { %2998 = vmatmul.mubr.bf16.gmra.mrb[4].mxu0 %v1536_v28 }
 0x29e   : > { %3001 = vmatprep.mubr.bf16.mxu0 %v1537_v29 }
 0x2a5   : > { %3002 = vmatmul.mubr.bf16.gmra.mrb[8].mxu0 %v1538_v34 }
 0x2a6   : > { %3005 = vmatprep.mubr.bf16.mxu0 %v1539_v35 }
 0x2ad   : > { %3006 = vmatmul.mubr.bf16.gmra.mrb[12].mxu0 %v1540_v40 }
 0x2ae   : > { %3009 = vmatprep.mubr.bf16.mxu0 %v1541_v41 }
 0x2b5   : > { %3010 = vmatmul.mubr.bf16.gmra.mrb[16].mxu0 %v1542_v46 }
 0x2b6   : > { %3013 = vmatprep.mubr.bf16.mxu0 %v1543_v47 }
 0x2bd   : > { %3014 = vmatmul.mubr.bf16.gmra.mrb[20].mxu0 %v1544_v52 }
 0x2be   : > { %3017 = vmatprep.mubr.bf16.mxu0 %v1545_v53 }
 0x2c5   : > { %3018 = vmatmul.mubr.bf16.gmra.mrb[24].mxu0 %v1546_v58 }
 0x2c6   : > { %3021 = vmatprep.mubr.bf16.mxu0 %v1547_v59 }
 0x2cd   : > { %3022 = vmatmul.mubr.bf16.gmra.mrb[28].mxu0 %v1548_v62 }
 0x368   : > { %v2995_v2 = vpop.f32.mrb[0].mxu0 }
 0x369   : > { %v1646_v3 = vadd.f32 %v2995_v2, %v4255_v1  ;;  %v1637_v4 = vpop.f32.mrb[1].mxu0 }
 0x36a   : > { %v1638_v5 = vadd.f32 %v4255_v1, %v1637_v4  ;;  %v2996_v6 = vpop.f32.mrb[2].mxu0 }
 0x36b   : > { %v1649_v7 = vadd.f32 %v2996_v6, %v4255_v1  ;;  %v1640_v8 = vpop.f32.mrb[3].mxu0  ;;  %v1766_v10 = vmax.f32 %v1646_v3, 0.0 }
 0x36c   : > { %v1641_v9 = vadd.f32 %v4255_v1, %v1640_v8  ;;  %v1764_v12 = vmax.f32 %v1638_v5, 0.0 }
 0x36d   : > { %v1767_v11 = vmax.f32 %v1649_v7, 0.0 }
 0x36e   : > { %v1765_v13 = vmax.f32 %v1641_v9, 0.0 }
 0x36f   : > { %v1814_v14 = vpack.c.bf16 %v1767_v11, %v1766_v10 }
 0x370   : > { %v2999_v15 = vpop.f32.mrb[4].mxu0  ;;  %v1813_v16 = vpack.c.bf16 %v1765_v13, %v1764_v12 }
 0x371   : > { %v1662_v17 = vadd.f32 %v2999_v15, %v4255_v1  ;;  %v1653_v18 = vpop.f32.mrb[5].mxu0 }
 0x372   : > { %v1654_v19 = vadd.f32 %v4255_v1, %v1653_v18  ;;  %v3000_v20 = vpop.f32.mrb[6].mxu0  ;;  %3041 = vmatprep.mubr.bf16.mxu1 %v1813_v16 }
 0x373   : > { %v1665_v21 = vadd.f32 %v3000_v20, %v4255_v1  ;;  %v1656_v22 = vpop.f32.mrb[7].mxu0  ;;  %3042 = vmatmul.mubr.bf16.vlgmr.msra.gmra.mrb[0].mxu1 %v1814_v14  ;;  %v1770_v24 = vmax.f32 %v1662_v17, 0.0 }
 0x374   : > { %v1657_v23 = vadd.f32 %v4255_v1, %v1656_v22  ;;  %v1768_v26 = vmax.f32 %v1654_v19, 0.0 }
 0x375   : > { %v1771_v25 = vmax.f32 %v1665_v21, 0.0 }
 0x376   : > { %v1769_v27 = vmax.f32 %v1657_v23, 0.0 }
 0x377   : > { %v1816_v28 = vpack.c.bf16 %v1771_v25, %v1770_v24 }
 0x378   : > { %v1815_v29 = vpack.c.bf16 %v1769_v27, %v1768_v26  ;;  %v3003_v30 = vpop.f32.mrb[8].mxu0 }
 0x379   : > { %v1678_v31 = vadd.f32 %v3003_v30, %v4255_v1  ;;  %v1669_v32 = vpop.f32.mrb[9].mxu0 }
 0x37a   : > { %v1670_v33 = vadd.f32 %v4255_v1, %v1669_v32  ;;  %v3004_v34 = vpop.f32.mrb[10].mxu0  ;;  %3045 = vmatprep.mubr.bf16.mxu1 %v1815_v29 }
 0x37b   : > { %v1681_v35 = vadd.f32 %v3004_v34, %v4255_v1  ;;  %v1672_v36 = vpop.f32.mrb[11].mxu0  ;;  %3046 = vmatmul.mubr.bf16.gmra.mrb[4].mxu1 %v1816_v28  ;;  %v1774_v38 = vmax.f32 %v1678_v31, 0.0 }
 0x37c   : > { %v1673_v37 = vadd.f32 %v4255_v1, %v1672_v36  ;;  %v1772_v40 = vmax.f32 %v1670_v33, 0.0 }
 0x37d   : > { %v1775_v39 = vmax.f32 %v1681_v35, 0.0 }
 0x37e   : > { %v1773_v41 = vmax.f32 %v1673_v37, 0.0 }
 0x37f   : > { %v1818_v42 = vpack.c.bf16 %v1775_v39, %v1774_v38 }
 0x380   : > { %v1817_v43 = vpack.c.bf16 %v1773_v41, %v1772_v40  ;;  %v3007_v44 = vpop.f32.mrb[12].mxu0 }
 0x381   : > { %v1694_v45 = vadd.f32 %v3007_v44, %v4255_v1  ;;  %v1685_v46 = vpop.f32.mrb[13].mxu0 }
 0x382   : > { %v1686_v47 = vadd.f32 %v4255_v1, %v1685_v46  ;;  %v3008_v48 = vpop.f32.mrb[14].mxu0  ;;  %3049 = vmatprep.mubr.bf16.mxu1 %v1817_v43 }
 0x383   : > { %v1697_v49 = vadd.f32 %v3008_v48, %v4255_v1  ;;  %v1688_v50 = vpop.f32.mrb[15].mxu0  ;;  %3050 = vmatmul.mubr.bf16.gmra.mrb[8].mxu1 %v1818_v42  ;;  %v1778_v52 = vmax.f32 %v1694_v45, 0.0 }
 0x384   : > { %v1689_v51 = vadd.f32 %v4255_v1, %v1688_v50  ;;  %v1776_v54 = vmax.f32 %v1686_v47, 0.0 }
 0x385   : > { %v1779_v53 = vmax.f32 %v1697_v49, 0.0 }
 0x386   : > { %v1777_v55 = vmax.f32 %v1689_v51, 0.0  ;;  %v4289_v51 = vld [vmem:[#allocation12] ss:$0 sm:$0xff] }
 0x387   : > { %v1820_v56 = vpack.c.bf16 %v1779_v53, %v1778_v52 }
 0x388   : > { %v1819_v57 = vpack.c.bf16 %v1777_v55, %v1776_v54  ;;  %v3011_v58 = vpop.f32.mrb[16].mxu0 }
 0x389   : > { %v1710_v59 = vadd.f32 %v3011_v58, %v4255_v1  ;;  %v1701_v60 = vpop.f32.mrb[17].mxu0 }
 0x38a   : > { %v1702_v61 = vadd.f32 %v4255_v1, %v1701_v60  ;;  %v3012_v62 = vpop.f32.mrb[18].mxu0  ;;  %3053 = vmatprep.mubr.bf16.mxu1 %v1819_v57 }
 0x38b   : > { %v1713_v63 = vadd.f32 %v3012_v62, %v4255_v1  ;;  %v1704_v0 = vpop.f32.mrb[19].mxu0  ;;  %3054 = vmatmul.mubr.bf16.gmra.mrb[12].mxu1 %v1820_v56  ;;  %v1782_v3 = vmax.f32 %v1710_v59, 0.0 }
 0x38c   : > { %v1705_v2 = vadd.f32 %v4255_v1, %v1704_v0  ;;  %v1780_v5 = vmax.f32 %v1702_v61, 0.0 }
 0x38d   : > { %v1783_v4 = vmax.f32 %v1713_v63, 0.0 }
 0x38e   : > { %v1781_v6 = vmax.f32 %v1705_v2, 0.0 }
 0x38f   : > { %v1822_v7 = vpack.c.bf16 %v1783_v4, %v1782_v3 }
 0x390   : > { %v1821_v8 = vpack.c.bf16 %v1781_v6, %v1780_v5  ;;  %v3015_v9 = vpop.f32.mrb[20].mxu0 }
 0x391   : > { %v1726_v10 = vadd.f32 %v3015_v9, %v4255_v1  ;;  %v1717_v11 = vpop.f32.mrb[21].mxu0 }
 0x392   : > { %v1718_v12 = vadd.f32 %v4255_v1, %v1717_v11  ;;  %v3016_v13 = vpop.f32.mrb[22].mxu0  ;;  %3057 = vmatprep.mubr.bf16.mxu1 %v1821_v8 }
 0x393   : > { %v1729_v14 = vadd.f32 %v3016_v13, %v4255_v1  ;;  %v1720_v15 = vpop.f32.mrb[23].mxu0  ;;  %3058 = vmatmul.mubr.bf16.gmra.mrb[16].mxu1 %v1822_v7  ;;  %v1786_v17 = vmax.f32 %v1726_v10, 0.0 }
 0x394   : > { %v1721_v16 = vadd.f32 %v4255_v1, %v1720_v15  ;;  %v1784_v19 = vmax.f32 %v1718_v12, 0.0 }
 0x395   : > { %v1787_v18 = vmax.f32 %v1729_v14, 0.0 }
 0x396   : > { %v1785_v20 = vmax.f32 %v1721_v16, 0.0 }
 0x397   : > { %v1824_v21 = vpack.c.bf16 %v1787_v18, %v1786_v17 }
 0x398   : > { %v1823_v22 = vpack.c.bf16 %v1785_v20, %v1784_v19  ;;  %v3019_v23 = vpop.f32.mrb[24].mxu0 }
 0x399   : > { %v1742_v24 = vadd.f32 %v3019_v23, %v4255_v1  ;;  %v1733_v25 = vpop.f32.mrb[25].mxu0 }
 0x39a   : > { %v1734_v26 = vadd.f32 %v4255_v1, %v1733_v25  ;;  %v3020_v27 = vpop.f32.mrb[26].mxu0  ;;  %3061 = vmatprep.mubr.bf16.mxu1 %v1823_v22 }
 0x39b   : > { %v1745_v28 = vadd.f32 %v3020_v27, %v4255_v1  ;;  %v1736_v29 = vpop.f32.mrb[27].mxu0  ;;  %3062 = vmatmul.mubr.bf16.gmra.mrb[20].mxu1 %v1824_v21  ;;  %v1790_v31 = vmax.f32 %v1742_v24, 0.0 }
 0x39c   : > { %v1737_v30 = vadd.f32 %v4255_v1, %v1736_v29  ;;  %v1788_v33 = vmax.f32 %v1734_v26, 0.0 }
 0x39d   : > { %v1791_v32 = vmax.f32 %v1745_v28, 0.0 }
 0x39e   : > { %v1789_v34 = vmax.f32 %v1737_v30, 0.0 }
 0x39f   : > { %v1826_v35 = vpack.c.bf16 %v1791_v32, %v1790_v31 }
 0x3a0   : > { %v1825_v36 = vpack.c.bf16 %v1789_v34, %v1788_v33  ;;  %v3023_v37 = vpop.f32.mrb[28].mxu0 }
 0x3a1   : > { %v1758_v38 = vadd.f32 %v3023_v37, %v4255_v1  ;;  %v1749_v39 = vpop.f32.mrb[29].mxu0 }
 0x3a2   : > { %v1750_v40 = vadd.f32 %v4255_v1, %v1749_v39  ;;  %v3024_v41 = vpop.f32.mrb[30].mxu0  ;;  %3065 = vmatprep.mubr.bf16.mxu1 %v1825_v36 }
 0x3a3   : > { %v1761_v42 = vadd.f32 %v3024_v41, %v4255_v1  ;;  %v1752_v43 = vpop.f32.mrb[31].mxu0  ;;  %3066 = vmatmul.mubr.bf16.gmra.mrb[24].mxu1 %v1826_v35  ;;  %v1794_v45 = vmax.f32 %v1758_v38, 0.0 }
 0x3a4   : > { %v1753_v44 = vadd.f32 %v4255_v1, %v1752_v43  ;;  %v1792_v47 = vmax.f32 %v1750_v40, 0.0 }
 0x3a5   : > { %v1795_v46 = vmax.f32 %v1761_v42, 0.0 }
 0x3a6   : > { %v1793_v48 = vmax.f32 %v1753_v44, 0.0 }
 0x3a7   : > { %v1828_v49 = vpack.c.bf16 %v1795_v46, %v1794_v45 }
 0x3a8   : > { %v1827_v50 = vpack.c.bf16 %v1793_v48, %v1792_v47 }
 0x3aa   : > { %3069 = vmatprep.mubr.bf16.mxu1 %v1827_v50 }
 0x3ab   : > { %3070 = vmatmul.mubr.bf16.gmra.mrb[28].mxu1 %v1828_v49 }
 0x446   : > { %v3043_v52 = vpop.f32.mrb[0].mxu1 }
 0x447   : > { %v1926_v53 = vadd.f32 %v3043_v52, %v4289_v51  ;;  %v1917_v54 = vpop.f32.mrb[1].mxu1 }
 0x448   : > { %v1918_v55 = vadd.f32 %v4289_v51, %v1917_v54  ;;  %v3044_v56 = vpop.f32.mrb[2].mxu1 }
 0x449   : > { %v1929_v1 = vadd.f32 %v3044_v56, %v4289_v51  ;;  %v1920_v57 = vpop.f32.mrb[3].mxu1  ;;  %v2046_v59 = vmax.f32 %v1926_v53, 0.0 }
 0x44a   : > { %v1921_v58 = vadd.f32 %v4289_v51, %v1920_v57  ;;  %v2044_v61 = vmax.f32 %v1918_v55, 0.0 }
 0x44b   : > { %v2047_v60 = vmax.f32 %v1929_v1, 0.0 }
 0x44c   : > { %v2045_v62 = vmax.f32 %v1921_v58, 0.0 }
 0x44d   : > { %v2618_v63 = vpack.c.bf16 %v2047_v60, %v2046_v59 }
 0x44e   : > { %v2613_v0 = vpack.c.bf16 %v2045_v62, %v2044_v61  ;;  %v3047_v2 = vpop.f32.mrb[4].mxu1 }
 0x44f   : > { %2690 = vst [vmem:[%s4155_s12 + $0x8] sm:$0xff] %v2618_v63   ;;  %v1942_v3 = vadd.f32 %v3047_v2, %v4289_v51  ;;  %v1933_v4 = vpop.f32.mrb[5].mxu1 }
 0x450   : > { %2614 = vst [vmem:[%s4155_s12] sm:$0xff] %v2613_v0   ;;  %v1934_v5 = vadd.f32 %v4289_v51, %v1933_v4  ;;  %v3048_v6 = vpop.f32.mrb[6].mxu1 }
 0x451   : > { %v1945_v7 = vadd.f32 %v3048_v6, %v4289_v51  ;;  %v1936_v8 = vpop.f32.mrb[7].mxu1  ;;  %v2050_v10 = vmax.f32 %v1942_v3, 0.0 }
 0x452   : > { %v1937_v9 = vadd.f32 %v4289_v51, %v1936_v8  ;;  %v2048_v12 = vmax.f32 %v1934_v5, 0.0 }
 0x453   : > { %v2051_v11 = vmax.f32 %v1945_v7, 0.0 }
 0x454   : > { %v2049_v13 = vmax.f32 %v1937_v9, 0.0 }
 0x455   : > { %v2628_v14 = vpack.c.bf16 %v2051_v11, %v2050_v10 }
 0x456   : > { %v2623_v15 = vpack.c.bf16 %v2049_v13, %v2048_v12  ;;  %v3051_v16 = vpop.f32.mrb[8].mxu1 }
 0x457   : > { %2692 = vst [vmem:[%s4155_s12 + $0x18] sm:$0xff] %v2628_v14   ;;  %v1958_v17 = vadd.f32 %v3051_v16, %v4289_v51  ;;  %v1949_v18 = vpop.f32.mrb[9].mxu1 }
 0x458   : > { %2691 = vst [vmem:[%s4155_s12 + $0x10] sm:$0xff] %v2623_v15   ;;  %v1950_v19 = vadd.f32 %v4289_v51, %v1949_v18  ;;  %v3052_v20 = vpop.f32.mrb[10].mxu1 }
 0x459   : > { %v1961_v21 = vadd.f32 %v3052_v20, %v4289_v51  ;;  %v1952_v22 = vpop.f32.mrb[11].mxu1  ;;  %v2054_v24 = vmax.f32 %v1958_v17, 0.0 }
 0x45a   : > { %v1953_v23 = vadd.f32 %v4289_v51, %v1952_v22  ;;  %v2052_v26 = vmax.f32 %v1950_v19, 0.0 }
 0x45b   : > { %v2055_v25 = vmax.f32 %v1961_v21, 0.0 }
 0x45c   : > { %v2053_v27 = vmax.f32 %v1953_v23, 0.0 }
 0x45d   : > { %v2638_v28 = vpack.c.bf16 %v2055_v25, %v2054_v24 }
 0x45e   : > { %v2633_v29 = vpack.c.bf16 %v2053_v27, %v2052_v26  ;;  %v3055_v30 = vpop.f32.mrb[12].mxu1 }
 0x45f   : > { %2694 = vst [vmem:[%s4155_s12 + $0x28] sm:$0xff] %v2638_v28   ;;  %v1974_v31 = vadd.f32 %v3055_v30, %v4289_v51  ;;  %v1965_v32 = vpop.f32.mrb[13].mxu1 }
 0x460   : > { %2693 = vst [vmem:[%s4155_s12 + $0x20] sm:$0xff] %v2633_v29   ;;  %v1966_v33 = vadd.f32 %v4289_v51, %v1965_v32  ;;  %v3056_v34 = vpop.f32.mrb[14].mxu1 }
 0x461   : > { %v1977_v35 = vadd.f32 %v3056_v34, %v4289_v51  ;;  %v1968_v36 = vpop.f32.mrb[15].mxu1  ;;  %v2058_v38 = vmax.f32 %v1974_v31, 0.0 }
 0x462   : > { %v1969_v37 = vadd.f32 %v4289_v51, %v1968_v36  ;;  %v2056_v40 = vmax.f32 %v1966_v33, 0.0 }
 0x463   : > { %v2059_v39 = vmax.f32 %v1977_v35, 0.0 }
 0x464   : > { %v2057_v41 = vmax.f32 %v1969_v37, 0.0 }
 0x465   : > { %v2648_v42 = vpack.c.bf16 %v2059_v39, %v2058_v38 }
 0x466   : > { %v2643_v43 = vpack.c.bf16 %v2057_v41, %v2056_v40  ;;  %v3059_v44 = vpop.f32.mrb[16].mxu1 }
 0x467   : > { %2696 = vst [vmem:[%s4155_s12 + $0x38] sm:$0xff] %v2648_v42   ;;  %v1990_v45 = vadd.f32 %v3059_v44, %v4289_v51  ;;  %v1981_v46 = vpop.f32.mrb[17].mxu1 }
 0x468   : > { %2695 = vst [vmem:[%s4155_s12 + $0x30] sm:$0xff] %v2643_v43   ;;  %v1982_v47 = vadd.f32 %v4289_v51, %v1981_v46  ;;  %v3060_v48 = vpop.f32.mrb[18].mxu1 }
 0x469   : > { %v1993_v49 = vadd.f32 %v3060_v48, %v4289_v51  ;;  %v1984_v50 = vpop.f32.mrb[19].mxu1  ;;  %v2062_v53 = vmax.f32 %v1990_v45, 0.0 }
 0x46a   : > { %v1985_v52 = vadd.f32 %v4289_v51, %v1984_v50  ;;  %v2060_v55 = vmax.f32 %v1982_v47, 0.0 }
 0x46b   : > { %v2063_v54 = vmax.f32 %v1993_v49, 0.0 }
 0x46c   : > { %v2061_v56 = vmax.f32 %v1985_v52, 0.0 }
 0x46d   : > { %v2658_v1 = vpack.c.bf16 %v2063_v54, %v2062_v53 }
 0x46e   : > { %v2653_v57 = vpack.c.bf16 %v2061_v56, %v2060_v55  ;;  %v3063_v58 = vpop.f32.mrb[20].mxu1 }
 0x46f   : > { %2698 = vst [vmem:[%s4155_s12 + $0x48] sm:$0xff] %v2658_v1   ;;  %v2006_v59 = vadd.f32 %v3063_v58, %v4289_v51  ;;  %v1997_v60 = vpop.f32.mrb[21].mxu1 }
 0x470   : > { %2697 = vst [vmem:[%s4155_s12 + $0x40] sm:$0xff] %v2653_v57   ;;  %v1998_v61 = vadd.f32 %v4289_v51, %v1997_v60  ;;  %v3064_v62 = vpop.f32.mrb[22].mxu1 }
 0x471   : > { %v2009_v63 = vadd.f32 %v3064_v62, %v4289_v51  ;;  %v2000_v0 = vpop.f32.mrb[23].mxu1  ;;  %v2066_v3 = vmax.f32 %v2006_v59, 0.0 }
 0x472   : > { %v2001_v2 = vadd.f32 %v4289_v51, %v2000_v0  ;;  %v2064_v5 = vmax.f32 %v1998_v61, 0.0 }
 0x473   : > { %v2067_v4 = vmax.f32 %v2009_v63, 0.0 }
 0x474   : > { %v2065_v6 = vmax.f32 %v2001_v2, 0.0 }
 0x475   : > { %v2668_v7 = vpack.c.bf16 %v2067_v4, %v2066_v3 }
 0x476   : > { %v2663_v8 = vpack.c.bf16 %v2065_v6, %v2064_v5  ;;  %v3067_v9 = vpop.f32.mrb[24].mxu1 }
 0x477   : > { %2700 = vst [vmem:[%s4155_s12 + $0x58] sm:$0xff] %v2668_v7   ;;  %v2022_v10 = vadd.f32 %v3067_v9, %v4289_v51  ;;  %v2013_v11 = vpop.f32.mrb[25].mxu1 }
 0x478   : > { %2699 = vst [vmem:[%s4155_s12 + $0x50] sm:$0xff] %v2663_v8   ;;  %v2014_v12 = vadd.f32 %v4289_v51, %v2013_v11  ;;  %v3068_v13 = vpop.f32.mrb[26].mxu1 }
 0x479   : > { %v2025_v14 = vadd.f32 %v3068_v13, %v4289_v51  ;;  %v2016_v15 = vpop.f32.mrb[27].mxu1  ;;  %v2070_v17 = vmax.f32 %v2022_v10, 0.0 }
 0x47a   : > { %v2017_v16 = vadd.f32 %v4289_v51, %v2016_v15  ;;  %v2068_v19 = vmax.f32 %v2014_v12, 0.0 }
 0x47b   : > { %v2071_v18 = vmax.f32 %v2025_v14, 0.0 }
 0x47c   : > { %v2069_v20 = vmax.f32 %v2017_v16, 0.0 }
 0x47d   : > { %v2678_v21 = vpack.c.bf16 %v2071_v18, %v2070_v17 }
 0x47e   : > { %v2673_v22 = vpack.c.bf16 %v2069_v20, %v2068_v19  ;;  %v3071_v23 = vpop.f32.mrb[28].mxu1 }
 0x47f   : > { %2702 = vst [vmem:[%s4155_s12 + $0x68] sm:$0xff] %v2678_v21   ;;  %v2038_v24 = vadd.f32 %v3071_v23, %v4289_v51  ;;  %v2029_v25 = vpop.f32.mrb[29].mxu1 }
 0x480   : > { %2701 = vst [vmem:[%s4155_s12 + $0x60] sm:$0xff] %v2673_v22   ;;  %v2030_v26 = vadd.f32 %v4289_v51, %v2029_v25  ;;  %v3072_v27 = vpop.f32.mrb[30].mxu1 }
 0x481   : > { %v2041_v28 = vadd.f32 %v3072_v27, %v4289_v51  ;;  %v2032_v29 = vpop.f32.mrb[31].mxu1  ;;  %v2074_v31 = vmax.f32 %v2038_v24, 0.0 }
 0x482   : > { %v2033_v30 = vadd.f32 %v4289_v51, %v2032_v29  ;;  %v2072_v33 = vmax.f32 %v2030_v26, 0.0 }
 0x483   : > { %v2075_v32 = vmax.f32 %v2041_v28, 0.0 }
 0x484   : > { %v2073_v34 = vmax.f32 %v2033_v30, 0.0 }
 0x485   : > { %v2688_v35 = vpack.c.bf16 %v2075_v32, %v2074_v31 }
 0x486   : > { %v2683_v36 = vpack.c.bf16 %v2073_v34, %v2072_v33 }
 0x487   : > { %2704 = vst [vmem:[%s4155_s12 + $0x78] sm:$0xff] %v2688_v35  }
 0x488   : > { %2703 = vst [vmem:[%s4155_s12 + $0x70] sm:$0xff] %v2683_v36  }
 0x489 PF: > { %s4508_s22 = sld [smem:[#allocation24_spill]]  ;;  %s4510_s30 = sld [smem:[#allocation28_spill]] }
 0x48a   : > { %s4511_s2 = sld [smem:[#allocation37_spill]]  ;;  %s2250_s3 = sshll.u32 %s4155_s12, 4  ;;  %s4346_s3 = int_to_ptr.vmem [resolvable:$true] %s2250_s3 }
 0x48b   : > { %s4350_s5 = scalar_lea.sflag [#allocation5], %s378_s16  ;;  %s3569_s9 = scalar_lea.vmem %s4346_s3, 2048 }
 0x48c   : > { %p3570_p13 = scmp.ne.s32.totalorder %s4346_s3, %s3569_s9  ;;  %s3745_s6 = smov [#allocation14]  }
 0x48d   : > { %s3573_s17 = sshll.u32 %s3745_s6, 4  ;;  %s3574_s17 = int_to_ptr.vmem [resolvable:$false] %s3573_s17 }
 0x48e   : > { %s3575_s11 = scalar_lea.vmem %s3574_s17, 4096  ;;  %p3576_p3 = scmp.lt.s32.totalorder %s4346_s3, %s3574_s17 }
 0x48f   : > { %s2609_s27 = sshll.u32 %s4508_s22, 11  ;;  %p4512_p9 = scmp.ne.s32.totalorder %s4510_s30, 0 }
 0x490   : > { %s4343_s4 = scalar_lea.hbm %s4511_s2, %s2609_s27  ;;  %p3577_p7 = scmp.lt.s32.totalorder %s3575_s11, %s3569_s9 }
 0x491   : > { %p3571_p11 = pnand %p3570_p13, %p4512_p9 }
 0x492   : > { %p3578_p5 = por %p3577_p7, %p3576_p3 }
 0x493   : > { %p3572_p8 = pneg %p3571_p11 }
 0x495   : > { %p3579_p1 = pnand %p3578_p5, %p3572_p8 }
 0x497   : > { %3582 = shalt.err (!%p3579_p1)
}
 0x498   : > { %s3583_s13 = scalar_lea.hbm %s4343_s4, 2048  ;;  %s3587_s12 = scalar_lea.hbm %s4511_s2, 8192 }
 0x499   : > { %p3584_p2 = scmp.ne.s32.totalorder %s4343_s4, %s3583_s13  ;;  %p3588_p10 = scmp.lt.u32.totalorder %s4343_s4, %s4511_s2 }
 0x49a   : > { %p3589_p0 = scmp.lt.u32.totalorder %s3587_s12, %s3583_s13  ;;  %p3591_p13 = scmp.lt.u32.totalorder %s3583_s13, %s4343_s4 }
 0x49b   : > { %p3585_p4 = pnand %p3584_p2, %p4512_p9 }
 0x49c   : > { %p3590_p6 = por %p3589_p0, %p3588_p10 }
 0x49d   : > { %p3586_p12 = pneg %p3585_p4 }
 0x49e   : > { %p3592_p11 = por %p3591_p13, %p3590_p6 }
 0x4a0   : > { %p3593_p8 = pnand %p3592_p11, %p3586_p12 }
 0x4a2   : > { %3596 = shalt.err (!%p3593_p8)
}
 0x4a3   : > { %s3746_s22 = smov 64   ;;  %s3747_s7 = smov 4  }
 0x4a4   : > { %3093 = dma.vmem_to_hbm [thread:$0]  (%p4512_p9), %s4346_s3, 2048, %s4343_s4, %s4350_s5, %s3746_s22, %s3746_s22, %s3747_s7  }
 0x4a5 PF: > { %s4513_s27 = sld [smem:[#allocation21_spill]]  ;;  %s4514_s20 = sld [smem:[#allocation29_spill]] }
 0x4a6   : > { %p3128_p3 = scmp.ge.s32.totalorder %s3731_s10, 2 }
 0x4ab   : > { %s2265_s0 = sand.u32 1, %s4513_s27   ;;  %p4515_p7 = scmp.ne.s32.totalorder %s4514_s20, 0 }
 0x4ac   : > { %s2266_s9 = scalar_lea.sflag [#allocation5], %s2265_s0 }
 0x4ad   : > { %p3116_p5 = pnand %p3128_p3, %p4515_p7 }
 0x4af   : > { %3674 = dma.done.wait (!%p3116_p5), %s2266_s9, 2048  }
 0x4b0   : > { %3676 = vsyncadd (!%p3116_p5), %s2266_s9, 4294965248  ;;  %s27_s10 = sadd.s32 1, %s3731_s10   ;;  %s4517_s17 = sld [smem:[#allocation22_spill]] }
 0x4b1   : > { %p4379_p1 = scmp.ge.s32.totalorder %s27_s10, 10   ;;  %s4518_s30 = smov %s4016_s21 }
 0x4b2   : > { %s4519_s7 = sld [smem:[#allocation25_spill]]  ;;  %s4520_s4 = sld [smem:[#allocation30_spill]] }
 0x4b3   : > { %s4521_s9 = sld [smem:[#allocation31_spill]]  ;;  %s4523_s22 = smov %s3687_s23 }
 0x4b4   : > { %s4524_s23 = smov %s4518_s30  ;;  %s4525_s24 = smov %s3695_s25 }
 0x4b5   : > { %s4526_s25 = smov %s3699_s26  ;;  %s4527_s26 = smov %s4073_s15 }
 0x4b6   : > { %s4522_s21 = smov %s4517_s17  ;;  %s4528_s27 = smov %s3707_s28 }
 0x4b7   : > { %s4529_s28 = smov %s3711_s29  ;;  %s4530_s29 = smov %s4019_s14 }
 0x4b8   : > { %s4531_s30 = smov %s3723_s8  ;;  %s4532_s8 = smov %s4520_s4 }
 0x4b9   :  { %26 = sbr.rel (!%p4379_p1) target bundleno = 21 (0x15), region = 126 }
 0x4c0   :  { %2271 = vsyncpa [#allocation4], 1 }
 0x4c1   :  { %2273 = vsyncpa [#allocation4 + $0x1], 1 }
 0x4c2   :  { %2274 = vsyncpa [#allocation7], 1 }
 0x4c3   :  { %2276 = vsyncpa [#allocation7 + $0x1], 1 }
 0x4c4   :  { %2277 = vsyncpa [#allocation10], 1 }
 0x4c5   :  { %2278 = vsyncpa [#allocation13], 1 }
 0x4c6   :  { %2279 = vsyncpa [#allocation5], 1 }
 0x4c7   :  { %2281 = vsyncpa [#allocation5 + $0x1], 1 }

</bundles_post_ra>
